<compile_context>
chip_gen: v7x
topology: tpu7x:2x2x1
jax: 0.10.0
libtpu: 0.0.40
codegen_flags: <defaults>
</compile_context>

<pallas_src>
import functools

import jax
import jax.numpy as jnp
from jax import lax
from jax.experimental import pallas as pl
from jax.experimental.pallas import tpu as pltpu


def _convlstm_kernel(x_ref, w_ref, b_ref, c_ref, h_out_ref, c_out_ref, *,
                     hidden_dim, kh, kw, strip_h, W):
    """One (batch, H-strip) grid step.

    x_ref     : (1, H+kh-1, W+kw-1, cp) bf16  spatially padded, channel-padded
                combined [input ++ h_cur] in NHWC (cp = multiple of 128).
    w_ref     : (kh*kw, 4*hid, cp)      bf16  per-tap packed weight (dx-major).
    b_ref     : (4*hid, 1)              f32   bias column.
    c_ref     : (1, hid, strip_h*W)     f32   previous cell-state strip.
    h_out_ref : (1, hid, strip_h*W)     f32   next hidden-state strip.
    c_out_ref : (1, hid, strip_h*W)     f32   next cell-state strip (aliases c).
    """
    hd = hidden_dim
    sHW = strip_h * W
    cp = x_ref.shape[3]
    row0 = pl.multiple_of(pl.program_id(1) * strip_h, strip_h)

    # kh*kw accumulating MXU dots straight from vregs (no im2col VMEM slab).
    # Only the dx shifts are sublane-misaligned; load each dx slab once and
    # reuse it for all dy (the dy slice is an outer-dim slice -> free).
    # TODO(synk): for large H*W (MXU-bound regime) switch back to a fused-slab
    # matmul and pack two taps per 128-lane K group to cut the zero padding.
    acc = None
    for dx in range(kw):
        slab = x_ref[0, pl.ds(row0, strip_h + kh - 1), dx:dx + W, :]
        for dy in range(kh):
            tap = dx * kh + dy                                 # matches packing
            patch = slab[dy:dy + strip_h].reshape(sHW, cp)     # (sHW, cp) bf16
            # (4*hd, cp) . (sHW, cp)^T -> (4*hd, sHW), f32 accumulation on MXU.
            contrib = lax.dot_general(
                w_ref[tap], patch,
                dimension_numbers=(((1,), (1,)), ((), ())),
                preferred_element_type=jnp.float32)
            acc = contrib if acc is None else acc + contrib

    pre = acc + b_ref[...]                          # (4*hd, sHW) + (4*hd, 1)

    # sigmoid(x) = 0.5 * (1 + tanh(x / 2)) -> all gate transcendentals are tanh.
    # TODO(synk): on v6e/v7x run the tanh in bf16 (bf16 EUP); keep f32 on v5e.
    ifo = 0.5 * jnp.tanh(0.5 * pre[:3 * hd]) + 0.5  # i, f, o gates
    i = ifo[:hd]
    f = ifo[hd:2 * hd]
    o = ifo[2 * hd:]
    g = jnp.tanh(pre[3 * hd:])

    c_cur = c_ref[0]                                # (hd, sHW) f32
    c_next = f * c_cur + i * g
    h_next = o * jnp.tanh(c_next)

    c_out_ref[0] = c_next.astype(c_out_ref.dtype)
    h_out_ref[0] = h_next.astype(h_out_ref.dtype)


def pack_conv_lstm_params(weight_oihw, bias, *, input_dim, hidden_dim,
                          kernel_size):
    """One-time weight/bias packing (amortized across timesteps)."""
    kh, kw = kernel_size
    cin = input_dim + hidden_dim
    cp = ((cin + 127) // 128) * 128                 # lane-pad contraction dim
    # OIHW (4*hd, cin, kh, kw) -> (kw, kh, 4*hd, cin) -> (kw*kh, 4*hd, cp) bf16.
    # Tap index = dx*kh + dy, matching the kernel's loop order.
    w = jnp.transpose(weight_oihw, (3, 2, 0, 1)).reshape(
        kw * kh, 4 * hidden_dim, cin)
    w = jnp.pad(w, ((0, 0), (0, 0), (0, cp - cin))).astype(jnp.bfloat16)
    b = bias.reshape(4 * hidden_dim, 1).astype(jnp.float32)
    return w, b


def _pick_strip_h(H, W):
    """Smallest H-strip whose output stays lane-dense (strip_h*W % 128 == 0),
    preferring >= 512 output lanes/step so per-step overhead stays small."""
    for min_lanes in (512, 128):
        for sh in range(1, H):
            if H % sh == 0 and (sh * W) % 128 == 0 and sh * W >= min_lanes:
                return sh
    return H


@functools.partial(jax.jit,
                   static_argnames=("hidden_dim", "kernel_size"),
                   donate_argnums=(2,))
def conv_lstm_cell(x_nchw, h_nchw, c_nchw, w_packed, b_col, *,
                   hidden_dim, kernel_size):
    """ConvLSTMCell.forward.  x/h/c are NCHW (PyTorch convention); w_packed /
    b_col come from pack_conv_lstm_params (done once, outside the step loop).
    c_nchw is donated so the in-kernel cell-state alias is a true in-place
    update."""
    kh, kw = kernel_size
    ph, pw = kh // 2, kw // 2
    B, Cx, H, W = x_nchw.shape
    cin = Cx + hidden_dim
    cp = w_packed.shape[-1]
    HW = H * W
    Hp, Wp = H + kh - 1, W + kw - 1

    # The in-kernel (strip_h, W, cp) -> (strip_h*W, cp) reshape is only free
    # when W is a multiple of the bf16 sublane pack.
    # TODO(synk): pad W (and mask the halo columns) for non-multiple-of-16 widths.
    assert W % 16 == 0, "W must be a multiple of 16 (bf16 sublane pack)"

    # Conv-input side: NCHW -> NHWC, concat [x, h], bf16 cast, 'same' spatial
    # pad + channel pad to the lane boundary so in-kernel slices are lane-exact.
    # TODO(synk): in the multi-step ConvLSTM carry h (and x) in NHWC/bf16 across
    # timesteps so these transposes happen once at the model boundary.
    x = jnp.transpose(x_nchw, (0, 2, 3, 1))
    h = jnp.transpose(h_nchw, (0, 2, 3, 1))
    combined = jnp.concatenate([x, h], axis=-1).astype(jnp.bfloat16)
    combined = jnp.pad(combined, ((0, 0), (ph, ph), (pw, pw), (0, cp - cin)))

    # Cell state stays channel-major: NCHW <-> (B, hd, H*W) is a pure reshape of
    # the donated buffer, so input_output_aliases below stays a real in-place
    # update (no defensive copy before the custom call).
    c = c_nchw.reshape(B, hidden_dim, HW).astype(jnp.float32)

    strip_h = _pick_strip_h(H, W)
    n_strips = H // strip_h
    sHW = strip_h * W

    kernel = functools.partial(_convlstm_kernel, hidden_dim=hidden_dim,
                               kh=kh, kw=kw, strip_h=strip_h, W=W)

    h_next, c_next = pl.pallas_call(
        kernel,
        out_shape=(jax.ShapeDtypeStruct((B, hidden_dim, HW), jnp.float32),
                   jax.ShapeDtypeStruct((B, hidden_dim, HW), jnp.float32)),
        grid_spec=pltpu.PrefetchScalarGridSpec(
            num_scalar_prefetch=0,
            grid=(B, n_strips),
            in_specs=[
                # Full padded frame per batch element; identical block index
                # across strips, so it is only DMA'd when b changes.
                pl.BlockSpec((1, Hp, Wp, cp), lambda b, s: (b, 0, 0, 0)),
                pl.BlockSpec((kh * kw, 4 * hidden_dim, cp),
                             lambda b, s: (0, 0, 0)),
                pl.BlockSpec((4 * hidden_dim, 1), lambda b, s: (0, 0)),
                pl.BlockSpec((1, hidden_dim, sHW), lambda b, s: (b, 0, s)),
            ],
            out_specs=[
                pl.BlockSpec((1, hidden_dim, sHW), lambda b, s: (b, 0, s)),
                pl.BlockSpec((1, hidden_dim, sHW), lambda b, s: (b, 0, s)),
            ],
        ),
        input_output_aliases={3: 1},      # in-place cell-state update
        compiler_params=pltpu.CompilerParams(
            dimension_semantics=("parallel", "parallel"),
            vmem_limit_bytes=32 * 1024 * 1024),
    )(combined, w_packed, b_col, c)

    # (B, hd, H*W) -> NCHW: pure reshape, no transpose / relayout.
    return (h_next.reshape(B, hidden_dim, H, W),
            c_next.reshape(B, hidden_dim, H, W))


def _reference(x, h, c, w, b, *, hidden_dim, kernel_size):
    """Pure-JAX reference mirroring the PyTorch module (NCHW, f32)."""
    kh, kw = kernel_size
    ph, pw = kh // 2, kw // 2
    combined = jnp.concatenate([x, h], axis=1)
    out = lax.conv_general_dilated(
        combined, w, window_strides=(1, 1), padding=[(ph, ph), (pw, pw)],
        dimension_numbers=("NCHW", "OIHW", "NCHW"))
    out = out + b[None, :, None, None]
    cc_i, cc_f, cc_o, cc_g = jnp.split(out, 4, axis=1)
    i = jax.nn.sigmoid(cc_i)
    f = jax.nn.sigmoid(cc_f)
    o = jax.nn.sigmoid(cc_o)
    g = jnp.tanh(cc_g)
    c_next = f * c + i * g
    h_next = o * jnp.tanh(c_next)
    return h_next, c_next


if __name__ == "__main__":
    # Module config (small, consistent with ConvLSTMCell.__init__).
    batch, input_dim, hidden_dim = 2, 4, 32
    H = W = 16
    kernel_size = (3, 3)

    key = jax.random.PRNGKey(0)
    k1, k2, k3, k4, k5 = jax.random.split(key, 5)

    cin = input_dim + hidden_dim
    # Deterministic synthetic parameters (PyTorch Conv2d weight layout OIHW).
    weight = 0.1 * jax.random.normal(k1, (4 * hidden_dim, cin, *kernel_size),
                                     jnp.float32)
    bias = 0.1 * jax.random.normal(k2, (4 * hidden_dim,), jnp.float32)

    # Inputs / previous state (NCHW, like the PyTorch module).
    x = jax.random.normal(k3, (batch, input_dim, H, W), jnp.float32)
    h_cur = jax.random.normal(k4, (batch, hidden_dim, H, W), jnp.float32)
    c_cur = jax.random.normal(k5, (batch, hidden_dim, H, W), jnp.float32)

    # References computed up-front (the kernel donates + aliases the cell state).
    h_ref, c_ref = _reference(x, h_cur, c_cur, weight, bias,
                              hidden_dim=hidden_dim, kernel_size=kernel_size)
    _q = lambda a: a.astype(jnp.bfloat16).astype(jnp.float32)   # bf16 quantize
    h_ref_q, c_ref_q = _reference(_q(x), _q(h_cur), c_cur, _q(weight), bias,
                                  hidden_dim=hidden_dim, kernel_size=kernel_size)
    jax.block_until_ready((h_ref, c_ref, h_ref_q, c_ref_q))

    # One-time parameter packing (amortized over timesteps in a real model).
    w_packed, b_col = pack_conv_lstm_params(
        weight, bias, input_dim=input_dim, hidden_dim=hidden_dim,
        kernel_size=kernel_size)
    jax.block_until_ready((w_packed, b_col))

    h_next, c_next = conv_lstm_cell(x, h_cur, c_cur, w_packed, b_col,
                                    hidden_dim=hidden_dim,
                                    kernel_size=kernel_size)
    jax.block_until_ready((h_next, c_next))

    assert h_next.shape == (batch, hidden_dim, H, W)
    assert c_next.shape == (batch, hidden_dim, H, W)
    # Tight check vs a reference using the same bf16 input quantization as the
    # kernel's MXU path (f32 accumulation in both).
    assert jnp.allclose(h_next, h_ref_q, atol=2e-3, rtol=2e-3)
    assert jnp.allclose(c_next, c_ref_q, atol=2e-3, rtol=2e-3)
    # Loose sanity check vs the exact f32 reference (bf16-input quantization only).
    assert jnp.allclose(h_next, h_ref, atol=1e-1, rtol=1e-1)
    assert jnp.allclose(c_next, c_ref, atol=1e-1, rtol=1e-1)

    print("KERNEL_OK")
</pallas_src>

<mosaic_0001>
module attributes {stable_mosaic.version = 11 : i64} {
  func.func @_convlstm_kernel(%arg0: i32, %arg1: i32, %arg2: memref<1x18x18x128xbf16, #tpu.memory_space<vmem>>, %arg3: memref<9x128x128xbf16, #tpu.memory_space<vmem>>, %arg4: memref<128x1xf32, #tpu.memory_space<vmem>>, %arg5: memref<1x32x128xf32, #tpu.memory_space<vmem>>, %arg6: memref<1x32x128xf32, #tpu.memory_space<vmem>>, %arg7: memref<1x32x128xf32, #tpu.memory_space<vmem>>) attributes {dimension_semantics = [#tpu.dimension_semantics<parallel>, #tpu.dimension_semantics<parallel>], iteration_bounds = array<i64: 2, 2>, scalar_prefetch = 0 : i64, scratch_operands = 0 : i64, tpu.core_type = #tpu.core_type<tc>, window_params = [{transform_indices = @transform_0, window_bounds = array<i64: 1, 18, 18, 128>}, {pipeline_mode = #tpu.pipeline_mode<synchronous>, transform_indices = @transform_1, window_bounds = array<i64: 9, 128, 128>}, {pipeline_mode = #tpu.pipeline_mode<synchronous>, transform_indices = @transform_2, window_bounds = array<i64: 128, 1>}, {transform_indices = @transform_3, window_bounds = array<i64: 1, 32, 128>}, {transform_indices = @transform_4, window_bounds = array<i64: 1, 32, 128>}, {transform_indices = @transform_5, window_bounds = array<i64: 1, 32, 128>}]} {
    %c8_i32 = arith.constant 8 : i32
    %0 = arith.muli %arg1, %c8_i32 : i32
    %1 = tpu.assume_multiple %0, 8 : i32
    %c0 = arith.constant 0 : index
    %2 = arith.index_cast %1 : i32 to index
    %c0_0 = arith.constant 0 : index
    %c0_1 = arith.constant 0 : index
    %3 = vector.load %arg2[%c0, %2, %c0_0, %c0_1] : memref<1x18x18x128xbf16, #tpu.memory_space<vmem>>, vector<1x10x16x128xbf16>
    %4 = vector.shape_cast %3 : vector<1x10x16x128xbf16> to vector<10x16x128xbf16>
    %5 = vector.extract_strided_slice %4 {offsets = [0, 0, 0], sizes = [8, 16, 128], strides = [1, 1, 1]} : vector<10x16x128xbf16> to vector<8x16x128xbf16>
    %6 = vector.shape_cast %5 : vector<8x16x128xbf16> to vector<128x128xbf16>
    %c0_2 = arith.constant 0 : index
    %c0_3 = arith.constant 0 : index
    %c0_4 = arith.constant 0 : index
    %7 = vector.load %arg3[%c0_2, %c0_3, %c0_4] : memref<9x128x128xbf16, #tpu.memory_space<vmem>>, vector<1x128x128xbf16>
    %8 = vector.shape_cast %7 : vector<1x128x128xbf16> to vector<128x128xbf16>
    %cst = arith.constant dense<0.000000e+00> : vector<128x128xf32>
    %9 = tpu.matmul %8, %6, %cst {dimension_numbers = #tpu.dot_dimension_numbers<[1], [1], [0], [0], [0, 0, 1, 0], [], []>} : vector<128x128xbf16>, vector<128x128xbf16>, vector<128x128xf32> -> vector<128x128xf32>
    %10 = vector.extract_strided_slice %4 {offsets = [1, 0, 0], sizes = [8, 16, 128], strides = [1, 1, 1]} : vector<10x16x128xbf16> to vector<8x16x128xbf16>
    %11 = vector.shape_cast %10 : vector<8x16x128xbf16> to vector<128x128xbf16>
    %c1 = arith.constant 1 : index
    %c0_5 = arith.constant 0 : index
    %c0_6 = arith.constant 0 : index
    %12 = vector.load %arg3[%c1, %c0_5, %c0_6] : memref<9x128x128xbf16, #tpu.memory_space<vmem>>, vector<1x128x128xbf16>
    %13 = vector.shape_cast %12 : vector<1x128x128xbf16> to vector<128x128xbf16>
    %cst_7 = arith.constant dense<0.000000e+00> : vector<128x128xf32>
    %14 = tpu.matmul %13, %11, %cst_7 {dimension_numbers = #tpu.dot_dimension_numbers<[1], [1], [0], [0], [0, 0, 1, 0], [], []>} : vector<128x128xbf16>, vector<128x128xbf16>, vector<128x128xf32> -> vector<128x128xf32>
    %15 = arith.addf %9, %14 : vector<128x128xf32>
    %16 = vector.extract_strided_slice %4 {offsets = [2, 0, 0], sizes = [8, 16, 128], strides = [1, 1, 1]} : vector<10x16x128xbf16> to vector<8x16x128xbf16>
    %17 = vector.shape_cast %16 : vector<8x16x128xbf16> to vector<128x128xbf16>
    %c2 = arith.constant 2 : index
    %c0_8 = arith.constant 0 : index
    %c0_9 = arith.constant 0 : index
    %18 = vector.load %arg3[%c2, %c0_8, %c0_9] : memref<9x128x128xbf16, #tpu.memory_space<vmem>>, vector<1x128x128xbf16>
    %19 = vector.shape_cast %18 : vector<1x128x128xbf16> to vector<128x128xbf16>
    %cst_10 = arith.constant dense<0.000000e+00> : vector<128x128xf32>
    %20 = tpu.matmul %19, %17, %cst_10 {dimension_numbers = #tpu.dot_dimension_numbers<[1], [1], [0], [0], [0, 0, 1, 0], [], []>} : vector<128x128xbf16>, vector<128x128xbf16>, vector<128x128xf32> -> vector<128x128xf32>
    %21 = arith.addf %15, %20 : vector<128x128xf32>
    %c0_11 = arith.constant 0 : index
    %22 = arith.index_cast %1 : i32 to index
    %c1_12 = arith.constant 1 : index
    %c0_13 = arith.constant 0 : index
    %23 = vector.load %arg2[%c0_11, %22, %c1_12, %c0_13] : memref<1x18x18x128xbf16, #tpu.memory_space<vmem>>, vector<1x10x16x128xbf16>
    %24 = vector.shape_cast %23 : vector<1x10x16x128xbf16> to vector<10x16x128xbf16>
    %25 = vector.extract_strided_slice %24 {offsets = [0, 0, 0], sizes = [8, 16, 128], strides = [1, 1, 1]} : vector<10x16x128xbf16> to vector<8x16x128xbf16>
    %26 = vector.shape_cast %25 : vector<8x16x128xbf16> to vector<128x128xbf16>
    %c3 = arith.constant 3 : index
    %c0_14 = arith.constant 0 : index
    %c0_15 = arith.constant 0 : index
    %27 = vector.load %arg3[%c3, %c0_14, %c0_15] : memref<9x128x128xbf16, #tpu.memory_space<vmem>>, vector<1x128x128xbf16>
    %28 = vector.shape_cast %27 : vector<1x128x128xbf16> to vector<128x128xbf16>
    %cst_16 = arith.constant dense<0.000000e+00> : vector<128x128xf32>
    %29 = tpu.matmul %28, %26, %cst_16 {dimension_numbers = #tpu.dot_dimension_numbers<[1], [1], [0], [0], [0, 0, 1, 0], [], []>} : vector<128x128xbf16>, vector<128x128xbf16>, vector<128x128xf32> -> vector<128x128xf32>
    %30 = arith.addf %21, %29 : vector<128x128xf32>
    %31 = vector.extract_strided_slice %24 {offsets = [1, 0, 0], sizes = [8, 16, 128], strides = [1, 1, 1]} : vector<10x16x128xbf16> to vector<8x16x128xbf16>
    %32 = vector.shape_cast %31 : vector<8x16x128xbf16> to vector<128x128xbf16>
    %c4 = arith.constant 4 : index
    %c0_17 = arith.constant 0 : index
    %c0_18 = arith.constant 0 : index
    %33 = vector.load %arg3[%c4, %c0_17, %c0_18] : memref<9x128x128xbf16, #tpu.memory_space<vmem>>, vector<1x128x128xbf16>
    %34 = vector.shape_cast %33 : vector<1x128x128xbf16> to vector<128x128xbf16>
    %cst_19 = arith.constant dense<0.000000e+00> : vector<128x128xf32>
    %35 = tpu.matmul %34, %32, %cst_19 {dimension_numbers = #tpu.dot_dimension_numbers<[1], [1], [0], [0], [0, 0, 1, 0], [], []>} : vector<128x128xbf16>, vector<128x128xbf16>, vector<128x128xf32> -> vector<128x128xf32>
    %36 = arith.addf %30, %35 : vector<128x128xf32>
    %37 = vector.extract_strided_slice %24 {offsets = [2, 0, 0], sizes = [8, 16, 128], strides = [1, 1, 1]} : vector<10x16x128xbf16> to vector<8x16x128xbf16>
    %38 = vector.shape_cast %37 : vector<8x16x128xbf16> to vector<128x128xbf16>
    %c5 = arith.constant 5 : index
    %c0_20 = arith.constant 0 : index
    %c0_21 = arith.constant 0 : index
    %39 = vector.load %arg3[%c5, %c0_20, %c0_21] : memref<9x128x128xbf16, #tpu.memory_space<vmem>>, vector<1x128x128xbf16>
    %40 = vector.shape_cast %39 : vector<1x128x128xbf16> to vector<128x128xbf16>
    %cst_22 = arith.constant dense<0.000000e+00> : vector<128x128xf32>
    %41 = tpu.matmul %40, %38, %cst_22 {dimension_numbers = #tpu.dot_dimension_numbers<[1], [1], [0], [0], [0, 0, 1, 0], [], []>} : vector<128x128xbf16>, vector<128x128xbf16>, vector<128x128xf32> -> vector<128x128xf32>
    %42 = arith.addf %36, %41 : vector<128x128xf32>
    %c0_23 = arith.constant 0 : index
    %43 = arith.index_cast %1 : i32 to index
    %c2_24 = arith.constant 2 : index
    %c0_25 = arith.constant 0 : index
    %44 = vector.load %arg2[%c0_23, %43, %c2_24, %c0_25] : memref<1x18x18x128xbf16, #tpu.memory_space<vmem>>, vector<1x10x16x128xbf16>
    %45 = vector.shape_cast %44 : vector<1x10x16x128xbf16> to vector<10x16x128xbf16>
    %46 = vector.extract_strided_slice %45 {offsets = [0, 0, 0], sizes = [8, 16, 128], strides = [1, 1, 1]} : vector<10x16x128xbf16> to vector<8x16x128xbf16>
    %47 = vector.shape_cast %46 : vector<8x16x128xbf16> to vector<128x128xbf16>
    %c6 = arith.constant 6 : index
    %c0_26 = arith.constant 0 : index
    %c0_27 = arith.constant 0 : index
    %48 = vector.load %arg3[%c6, %c0_26, %c0_27] : memref<9x128x128xbf16, #tpu.memory_space<vmem>>, vector<1x128x128xbf16>
    %49 = vector.shape_cast %48 : vector<1x128x128xbf16> to vector<128x128xbf16>
    %cst_28 = arith.constant dense<0.000000e+00> : vector<128x128xf32>
    %50 = tpu.matmul %49, %47, %cst_28 {dimension_numbers = #tpu.dot_dimension_numbers<[1], [1], [0], [0], [0, 0, 1, 0], [], []>} : vector<128x128xbf16>, vector<128x128xbf16>, vector<128x128xf32> -> vector<128x128xf32>
    %51 = arith.addf %42, %50 : vector<128x128xf32>
    %52 = vector.extract_strided_slice %45 {offsets = [1, 0, 0], sizes = [8, 16, 128], strides = [1, 1, 1]} : vector<10x16x128xbf16> to vector<8x16x128xbf16>
    %53 = vector.shape_cast %52 : vector<8x16x128xbf16> to vector<128x128xbf16>
    %c7 = arith.constant 7 : index
    %c0_29 = arith.constant 0 : index
    %c0_30 = arith.constant 0 : index
    %54 = vector.load %arg3[%c7, %c0_29, %c0_30] : memref<9x128x128xbf16, #tpu.memory_space<vmem>>, vector<1x128x128xbf16>
    %55 = vector.shape_cast %54 : vector<1x128x128xbf16> to vector<128x128xbf16>
    %cst_31 = arith.constant dense<0.000000e+00> : vector<128x128xf32>
    %56 = tpu.matmul %55, %53, %cst_31 {dimension_numbers = #tpu.dot_dimension_numbers<[1], [1], [0], [0], [0, 0, 1, 0], [], []>} : vector<128x128xbf16>, vector<128x128xbf16>, vector<128x128xf32> -> vector<128x128xf32>
    %57 = arith.addf %51, %56 : vector<128x128xf32>
    %58 = vector.extract_strided_slice %45 {offsets = [2, 0, 0], sizes = [8, 16, 128], strides = [1, 1, 1]} : vector<10x16x128xbf16> to vector<8x16x128xbf16>
    %59 = vector.shape_cast %58 : vector<8x16x128xbf16> to vector<128x128xbf16>
    %c8 = arith.constant 8 : index
    %c0_32 = arith.constant 0 : index
    %c0_33 = arith.constant 0 : index
    %60 = vector.load %arg3[%c8, %c0_32, %c0_33] : memref<9x128x128xbf16, #tpu.memory_space<vmem>>, vector<1x128x128xbf16>
    %61 = vector.shape_cast %60 : vector<1x128x128xbf16> to vector<128x128xbf16>
    %cst_34 = arith.constant dense<0.000000e+00> : vector<128x128xf32>
    %62 = tpu.matmul %61, %59, %cst_34 {dimension_numbers = #tpu.dot_dimension_numbers<[1], [1], [0], [0], [0, 0, 1, 0], [], []>} : vector<128x128xbf16>, vector<128x128xbf16>, vector<128x128xf32> -> vector<128x128xf32>
    %63 = arith.addf %57, %62 : vector<128x128xf32>
    %c0_35 = arith.constant 0 : index
    %c0_36 = arith.constant 0 : index
    %64 = vector.load %arg4[%c0_35, %c0_36] : memref<128x1xf32, #tpu.memory_space<vmem>>, vector<128x1xf32>
    %65 = vector.broadcast %64 : vector<128x1xf32> to vector<128x128xf32>
    %66 = arith.addf %63, %65 : vector<128x128xf32>
    %67 = vector.extract_strided_slice %66 {offsets = [0, 0], sizes = [96, 128], strides = [1, 1]} : vector<128x128xf32> to vector<96x128xf32>
    %cst_37 = arith.constant 5.000000e-01 : f32
    %68 = vector.broadcast %cst_37 : f32 to vector<96x128xf32>
    %69 = arith.mulf %68, %67 : vector<96x128xf32>
    %70 = math.tanh %69 : vector<96x128xf32>
    %cst_38 = arith.constant 5.000000e-01 : f32
    %71 = vector.broadcast %cst_38 : f32 to vector<96x128xf32>
    %72 = arith.mulf %71, %70 : vector<96x128xf32>
    %cst_39 = arith.constant 5.000000e-01 : f32
    %73 = vector.broadcast %cst_39 : f32 to vector<96x128xf32>
    %74 = arith.addf %72, %73 : vector<96x128xf32>
    %75 = vector.extract_strided_slice %74 {offsets = [0, 0], sizes = [32, 128], strides = [1, 1]} : vector<96x128xf32> to vector<32x128xf32>
    %76 = vector.extract_strided_slice %74 {offsets = [32, 0], sizes = [32, 128], strides = [1, 1]} : vector<96x128xf32> to vector<32x128xf32>
    %77 = vector.extract_strided_slice %74 {offsets = [64, 0], sizes = [32, 128], strides = [1, 1]} : vector<96x128xf32> to vector<32x128xf32>
    %78 = vector.extract_strided_slice %66 {offsets = [96, 0], sizes = [32, 128], strides = [1, 1]} : vector<128x128xf32> to vector<32x128xf32>
    %79 = math.tanh %78 : vector<32x128xf32>
    %c0_40 = arith.constant 0 : index
    %c0_41 = arith.constant 0 : index
    %c0_42 = arith.constant 0 : index
    %80 = vector.load %arg5[%c0_40, %c0_41, %c0_42] : memref<1x32x128xf32, #tpu.memory_space<vmem>>, vector<1x32x128xf32>
    %81 = vector.shape_cast %80 : vector<1x32x128xf32> to vector<32x128xf32>
    %82 = arith.mulf %76, %81 : vector<32x128xf32>
    %83 = arith.mulf %75, %79 : vector<32x128xf32>
    %84 = arith.addf %82, %83 : vector<32x128xf32>
    %85 = math.tanh %84 : vector<32x128xf32>
    %86 = arith.mulf %77, %85 : vector<32x128xf32>
    %c0_43 = arith.constant 0 : index
    %c0_44 = arith.constant 0 : index
    %c0_45 = arith.constant 0 : index
    %87 = vector.load %arg7[%c0_43, %c0_44, %c0_45] : memref<1x32x128xf32, #tpu.memory_space<vmem>>, vector<1x32x128xf32>
    %88 = vector.shape_cast %87 : vector<1x32x128xf32> to vector<32x128xf32>
    %89 = vector.shape_cast %84 : vector<32x128xf32> to vector<1x32x128xf32>
    tpu.vector_store %arg7[%c0_43, %c0_44, %c0_45], %89 {strides = array<i32>} : memref<1x32x128xf32, #tpu.memory_space<vmem>>, vector<1x32x128xf32>,
    %c0_46 = arith.constant 0 : index
    %c0_47 = arith.constant 0 : index
    %c0_48 = arith.constant 0 : index
    %90 = vector.load %arg6[%c0_46, %c0_47, %c0_48] : memref<1x32x128xf32, #tpu.memory_space<vmem>>, vector<1x32x128xf32>
    %91 = vector.shape_cast %90 : vector<1x32x128xf32> to vector<32x128xf32>
    %92 = vector.shape_cast %86 : vector<32x128xf32> to vector<1x32x128xf32>
    tpu.vector_store %arg6[%c0_46, %c0_47, %c0_48], %92 {strides = array<i32>} : memref<1x32x128xf32, #tpu.memory_space<vmem>>, vector<1x32x128xf32>,
    return
  }
  func.func @transform_0(%arg0: i32, %arg1: i32) -> (i32, i32, i32, i32) {
    %c0_i32 = arith.constant 0 : i32
    %c0_i32_0 = arith.constant 0 : i32
    %c0_i32_1 = arith.constant 0 : i32
    %c0_i32_2 = arith.constant 0 : i32
    return %arg0, %c0_i32, %c0_i32_0, %c0_i32_1 : i32, i32, i32, i32
  }
  func.func @transform_1(%arg0: i32, %arg1: i32) -> (i32, i32, i32) {
    %c0_i32 = arith.constant 0 : i32
    %c0_i32_0 = arith.constant 0 : i32
    %c0_i32_1 = arith.constant 0 : i32
    %c0_i32_2 = arith.constant 0 : i32
    return %c0_i32, %c0_i32_0, %c0_i32_1 : i32, i32, i32
  }
  func.func @transform_2(%arg0: i32, %arg1: i32) -> (i32, i32) {
    %c0_i32 = arith.constant 0 : i32
    %c0_i32_0 = arith.constant 0 : i32
    %c0_i32_1 = arith.constant 0 : i32
    return %c0_i32, %c0_i32_0 : i32, i32
  }
  func.func @transform_3(%arg0: i32, %arg1: i32) -> (i32, i32, i32) {
    %c0_i32 = arith.constant 0 : i32
    %c0_i32_0 = arith.constant 0 : i32
    return %arg0, %c0_i32, %arg1 : i32, i32, i32
  }
  func.func @transform_4(%arg0: i32, %arg1: i32) -> (i32, i32, i32) {
    %c0_i32 = arith.constant 0 : i32
    %c0_i32_0 = arith.constant 0 : i32
    return %arg0, %c0_i32, %arg1 : i32, i32, i32
  }
  func.func @transform_5(%arg0: i32, %arg1: i32) -> (i32, i32, i32) {
    %c0_i32 = arith.constant 0 : i32
    %c0_i32_0 = arith.constant 0 : i32
    return %arg0, %c0_i32, %arg1 : i32, i32, i32
  }
}

</mosaic_0001>

<bundles_post_ra>
// kernel: conv_lstm_cell.1
= control target key start
LH: loop header
LB: loop body
LE: loop exit
PB: predicated region body
PF: predicated region fallthrough
CT: control target
= control target key end

     0   :  { %s3963_s18 = smov 0   ;;  %s3965_s19 = smov 0   ;;  %s4758_s0 = inlined_call_operand.vmem [shape: bf16[2,18,18,128], index: 0, kind: input, shape index: {}]   ;;  %s4759_s1 = inlined_call_operand.vmem [shape: bf16[9,128,128], index: 1, kind: input, shape index: {}]   ;;  %s4760_s2 = inlined_call_operand.vmem [shape: f32[128,1], index: 2, kind: input, shape index: {}]   ;;  %s4761_s3 = inlined_call_operand.vmem [shape: f32[2,32,256], index: 3, kind: input, shape index: {}, may-alias: {3,5}]   ;;  %s4762_s4 = inlined_call_operand.vmem [shape: f32[2,32,256], index: 4, kind: output, shape index: {0}]   ;;  %s4763_s5 = inlined_call_operand.vmem [shape: f32[2,32,256], index: 5, kind: output, shape index: {1}, may-alias: {3,5}]  }
   0x1   :  { %s3967_s20 = smov 0   ;;  %s3969_s21 = smov 0  }
   0x2   :  { %s3971_s22 = smov 0   ;;  %s3973_s23 = smov 0  }
   0x3   :  { %s3975_s24 = smov 0  }
   0x4 LB: > { %s25_s25 = sadd.s32 1, %s3922_s22  ;;  %s28_s26 = sadd.s32 1, %s3926_s23  ;;  %s3930_s24 = sphi %s3975_s24, %s16_s24   ;;  %s3926_s23 = sphi %s3973_s23, %s4774_s23   ;;  %s3922_s22 = sphi %s3971_s22, %s4773_s22   ;;  %s3918_s21 = sphi %s3969_s21, %s4772_s21   ;;  %s3914_s20 = sphi %s3967_s20, %s4771_s20   ;;  %s3910_s19 = sphi %s3965_s19, %s4770_s19   ;;  %s3906_s18 = sphi %s3963_s18, %s4769_s18  }
   0x5   : > { %p26_p0 = scmp.ge.s32.totalorder %s25_s25, 2  ;;  %s2854_s27 = sadd.s32 4294967295, %s3930_s24  }
   0x6   : > { %p112_p1 = scmp.ne.s32.totalorder %s3910_s19, %s3906_s18  ;;  %p113_p2 = scmp.eq.s32.totalorder %s3930_s24, 0 }
   0x7   : > { %s4776_s25 = smov (%p26_p0, %s25_s25), 0  ;;  %s4778_s26 = smov (!%p26_p0, %s28_s26), %s3926_s23 }
   0x8   : > { %p30_p3 = scmp.ge.s32.totalorder %s4778_s26, 2  ;;  %p144_p4 = scmp.eq.s32.totalorder %s2854_s27, 3 }
   0x9   : > { %s101_s28 = ssub.s32 %s3922_s22, %s4776_s25  ;;  %p114_p5 = por %p113_p2, %p112_p1 }
   0xa   : > { %s4780_s26 = smov (%p30_p3, %s4778_s26), 0  ;;  %p4011_p6 = por %p144_p4, %p112_p1 }
   0xb   : > { %s100_s30 = ssub.s32 %s3926_s23, %s4780_s26  ;;  %s105_s7 = sadd.s32 1, %s3910_s19 }
   0xc   : > { %s102_s6 = sor.u32 %s101_s28, %s100_s30  ;;  %p2857_p8 = scmp.ge.s32.totalorder %s3930_s24, 4 }
   0xd   : > { %p103_p7 = scmp.eq.s32.totalorder %s102_s6, 0 }
   0xe   : > { %200 = sbr.rel (%p2857_p8) target bundleno = 29 (0x1d), region = 24 }
   0xf   : > { %s4019_s8 = scalar_select %p103_p7, %s3910_s19, %s105_s7  }
  0x15   : > { %211 = sbr.rel (!%p114_p5) target bundleno = 29 (0x1d), region = 32  ;;  %s213_s9 = sand.u32 (%p114_p5), 1, %s3910_s19  }
  0x16   : > { %s2859_s10 = sshll.u32 (%p114_p5), %s3926_s23, 3  ;;  %s2858_s11 = sshll.u32 (%p114_p5), %s213_s9, 5 }
  0x17   : > { %s217_s12 = sadd.s32 (%p114_p5), %s3922_s22, %s2859_s10  ;;  %s215_s17 = scalar_lea.vmem (%p114_p5), [#allocation2], %s2858_s11 }
  0x18   : > { %s2860_s13 = sshll.u32 (%p114_p5), %s217_s12, 3 }
  0x19   : > { %s219_s16 = scalar_lea.vmem (%p114_p5), %s4761_s3, %s2860_s13 }
  0x1a   : > { %v253_v0 = vld [vmem:[%s219_s16] sm:$0xff] (%p114_p5)  ;;  %v255_v1 = vld [vmem:[%s219_s16 + $0x10] sm:$0xff] (%p114_p5) }
  0x1b   : > { %v257_v2 = vld [vmem:[%s219_s16 + $0x20] sm:$0xff] (%p114_p5)  ;;  %254 = vst [vmem:[%s215_s17] sm:$0xff] (%p114_p5), %v253_v0  ;;  %256 = vst [vmem:[%s215_s17 + $0x8] sm:$0xff] (%p114_p5), %v255_v1  ;;  %v259_v3 = vld [vmem:[%s219_s16 + $0x30] sm:$0xff] (%p114_p5) }
  0x1c   : > { %258 = vst [vmem:[%s215_s17 + $0x10] sm:$0xff] %v257_v2  ;;  %260 = vst [vmem:[%s215_s17 + $0x18] sm:$0xff] %v259_v3 }
  0x1d PF: > { %p2861_p9 = scmp.ge.s32.totalorder %s3930_s24, 1  ;;  %p265_p10 = scmp.lt.s32.totalorder %s3930_s24, 5 }
  0x1f   : > { %p266_p11 = pnand %p2861_p9, %p265_p10 }
  0x20   : > { %p307_p12 = scmp.lt.s32.totalorder (!%p266_p11), %s3918_s21, 1  ;;  %v3762_v4 = vld [vmem:[%s4759_s1 + $0x40] sm:$0xff] (!%p266_p11)   ;;  %s3117_s6 = smul.u32 (!%p266_p11), 96, %s3914_s20  ;;  %vm928_vm0 = vsmask.f32 (!%p266_p11), 3328  ;;  %vm1779_vm2 = vcmask (!%p266_p11), 1042432  }
  0x21   : > { %269 = sbr.rel (%p266_p11) target bundleno = 656 (0x290), region = 70  ;;  %3278 = vmatprep.mubr.bf16.mxu1 (!%p266_p11), %v3762_v4  ;;  %v3765_v5 = vld [vmem:[%s4759_s1 + $0x100] sm:$0xff] (!%p266_p11)   ;;  %vm929_vm1 = vsmask.f32 (!%p266_p11), 7440  ;;  %vm1780_vm3 = vcmask (!%p266_p11), 1046532   ;;  %v3801_v33 = vld [vmem:[%s4759_s1 + $0x98] sm:$0xff] (!%p266_p11)  }
  0x22   : > { %3406 = vmatprep.mubr.bf16.mxu0 (!%p266_p11), %v3765_v5  ;;  %vm4072_vm4 = vmor (!%p266_p11), %vm928_vm0, %vm929_vm1  ;;  %v3830_v50 = vld [vmem:[%s4759_s1 + $0x230] sm:$0xff] (!%p266_p11)   ;;  %s272_s17 = sand.u32 (!%p266_p11), 1, %s3906_s18  }
  0x23   : > { %vm4085_vm5 = vmor (!%p266_p11), %vm1779_vm2, %vm1780_vm3 }
  0x28   : > { %s308_s27 = scalar_select %p307_p12, %s3918_s21, 1 }
  0x29   : > { %s3111_s30 = sshll.u32 (%p4011_p6), %s3918_s21, 3 }
  0x2a   : > { %s3694_s7 = smul.u32 216, %s308_s27  ;;  %s4708_s27 = sshll.u32 %s272_s17, 5 }
  0x2b   : > { %s274_s18 = scalar_lea.vmem [#allocation2], %s4708_s27  ;;  %s300_s28 = scalar_lea.vmem [#allocation3], %s4708_s27 }
  0x2c   : > { %s311_s13 = scalar_lea.vmem %s4758_s0, %s3694_s7 }
  0x2d   : > { %s4042_s14 = scalar_lea.vmem %s311_s13, %s3117_s6  ;;  %s2640_s6 = sadd.s32 (%p4011_p6), %s3914_s20, %s3111_s30 }
  0x2e   : > { %v4045_v6 = vld [vmem:[%s4042_s14 + $0xc] sm:$0xff]   ;;  %v4048_v7 = vld [vmem:[%s4042_s14 + $0x18] sm:$0xff]   ;;  %v4056_v10 = vld [vmem:[%s4042_s14 + $0x14] sm:$0x1]  ;;  %s3112_s7 = sshll.u32 (%p4011_p6), %s2640_s6, 3 }
  0x2f   : > { %3262 = vmatprep.subr.bf16.mxu1 %v4045_v6  ;;  %v901_v8 = vld [vmem:[%s4042_s14 + $0xc] sm:$0xf]  ;;  %v4053_v9 = vld [vmem:[%s4042_s14 + $0x10] sm:$0xf]  ;;  %v975_v15 = vshll.u32 %v4056_v10, 16  ;;  %v4066_v23 = vld [vmem:[%s4042_s14 + $0x24] sm:$0xff]   ;;  %s2642_s11 = scalar_lea.vmem (%p4011_p6), %s4762_s4, %s3112_s7 }
  0x30   : > { %3263 = vmatpush3.bf16.xpose.msra.mxu1 %v4045_v6  ;;  %v956_v11 = vshrl.u32 %v901_v8, 16  ;;  %v959_v12 = vshll.u32 %v901_v8, 16  ;;  %v965_v13 = vshll.u32 %v4053_v9, 16  ;;  %v969_v14 = vshrl.u32 %v4053_v9, 16  ;;  %v904_v16 = vld [vmem:[%s4042_s14 + $0x18] sm:$0xf] }
  0x31   : > { %3264 = vmatprep.subr.bf16.mxu1 %v4048_v7  ;;  %v905_v21 = vld [vmem:[%s4042_s14 + $0x1c] sm:$0xf]  ;;  %v977_v22 = vrot.slane %v975_v15, 5  ;;  %v906_v24 = vld [vmem:[%s4042_s14 + $0x20] sm:$0x1]  ;;  %v980_v25 = vshrl.u32 %v904_v16, 16 }
  0x32   : > { %v958_v17 = vrot.slane %v956_v11, 4  ;;  %v961_v18 = vrot.slane %v959_v12, 5  ;;  %v967_v19 = vrot.slane %v965_v13, 5  ;;  %v971_v20 = vrot.slane %v969_v14, 4  ;;  %v1747_v32 = vld [vmem:[%s4042_s14 + $0x18] sm:$0xe] }
  0x33   : > { %v983_v26 = vshll.u32 %v904_v16, 16  ;;  %v989_v27 = vshll.u32 %v905_v21, 16  ;;  %v993_v30 = vshrl.u32 %v905_v21, 16  ;;  %v999_v31 = vshll.u32 %v906_v24, 16  ;;  %v907_v45 = vld [vmem:[%s4042_s14 + $0x24] sm:$0xf] }
  0x34   : > { %v962_v28 = vor.u32 %v961_v18, %v958_v17  ;;  %v972_v29 = vor.u32 %v971_v20, %v967_v19  ;;  %v982_v34 = vrot.slane %v980_v25, 4  ;;  %v3019_v37 = vrot.slane %v1747_v32, 9  ;;  %v908_v46 = vld [vmem:[%s4042_s14 + $0x28] sm:$0xf]  ;;  %v909_v51 = vld [vmem:[%s4042_s14 + $0x2c] sm:$0x1] }
  0x35   : > { %v985_v35 = vrot.slane %v983_v26, 5  ;;  %v991_v36 = vrot.slane %v989_v27, 5  ;;  %v995_v40 = vrot.slane %v993_v30, 4  ;;  %v1001_v41 = vrot.slane %v999_v31, 5  ;;  %v1748_v61 = vld [vmem:[%s4042_s14 + $0x24] sm:$0xe] }
  0x36   : > { %v963_v38 = vrot.slane %v962_v28, 4  ;;  %v973_v39 = vrot.slane %v972_v29, 4  ;;  %v1798_v43 = vrot.slane %v905_v21, 5  ;;  %v1801_v44 = vrot.slane %v906_v24, 5  ;;  %v910_v2 = vld [vmem:[%s4042_s14 + $0x30] sm:$0xf] }
  0x37   : > { %v986_v42 = vor.u32 %v985_v35, %v982_v34  ;;  %v996_v49 = vor.u32 %v995_v40, %v991_v36  ;;  %v1004_v52 = vshrl.u32 %v907_v45, 16  ;;  %v1007_v59 = vshll.u32 %v907_v45, 16  ;;  %v911_v11 = vld [vmem:[%s4042_s14 + $0x34] sm:$0xf]  ;;  %v912_v20 = vld [vmem:[%s4042_s14 + $0x38] sm:$0x1] }
  0x38   : > { %3265 = vmatpush3.bf16.xpose.msra.mxu1 %v4048_v7  ;;  %v968_v47 = vsel %vm4072_vm4, %v963_v38, %v967_v19  ;;  %v978_v48 = vsel %vm4072_vm4, %v973_v39, %v977_v22  ;;  %v1799_v55 = vsel %vm4085_vm5, %v3019_v37, %v1798_v43  ;;  %v1800_v56 = vrot.slane %v1798_v43, 4  ;;  %v4111_v13 = vld [vmem:[%s4042_s14 + $0x30] sm:$0xff]   ;;  %v913_v37 = vld [vmem:[%s4042_s14 + $0x3c] sm:$0xf] }
  0x39   : > { %v4090_v53 = vcombine.low %v968_v47, %v978_v48  ;;  %3266 = vmatprep.subr.bf16.mxu1 %v4066_v23  ;;  %v987_v54 = vrot.slane %v986_v42, 4  ;;  %v997_v57 = vrot.slane %v996_v49, 4  ;;  %v1006_v58 = vrot.slane %v1004_v52, 4  ;;  %v1749_v27 = vld [vmem:[%s4042_s14 + $0x30] sm:$0xe]  ;;  %v4134_v48 = vld [vmem:[%s4042_s14 + $0x3c] sm:$0xff]  }
  0x3a   : > { %v1013_v60 = vshll.u32 %v908_v46, 16  ;;  %v1802_v63 = vsel %vm4085_vm5, %v1800_v56, %v1801_v44  ;;  %v1017_v0 = vshrl.u32 %v908_v46, 16  ;;  %v1023_v1 = vshll.u32 %v909_v51, 16 }
  0x3b   : > { %3390 = vmatprep.subr.bf16.mxu0 %v4090_v53  ;;  %v992_v62 = vsel %vm4072_vm4, %v987_v54, %v991_v36  ;;  %v1002_v3 = vsel %vm4072_vm4, %v997_v57, %v1001_v41  ;;  %v4105_v4 = vcombine.low %v1799_v55, %v1802_v63  ;;  %v1009_v5 = vrot.slane %v1007_v59, 5  ;;  %v915_v54 = vld [vmem:[%s4042_s14 + $0x44] sm:$0x1]  ;;  %v1750_v55 = vld [vmem:[%s4042_s14 + $0x3c] sm:$0xe] }
  0x3c   : > { %3391 = vmatpush3.bf16.xpose.msra.mxu0 %v4090_v53  ;;  %v1015_v8 = vrot.slane %v1013_v60, 5  ;;  %v4108_v12 = vcombine.low %v992_v62, %v1002_v3  ;;  %v1019_v14 = vrot.slane %v1017_v0, 4  ;;  %v1025_v15 = vrot.slane %v1023_v1, 5 }
  0x3d   : > { %v3020_v16 = vrot.slane %v1748_v61, 9  ;;  %v1010_v17 = vor.u32 %v1009_v5, %v1006_v58  ;;  %v1805_v18 = vrot.slane %v908_v46, 5  ;;  %v1808_v19 = vrot.slane %v909_v51, 5  ;;  %v914_v46 = vld [vmem:[%s4042_s14 + $0x40] sm:$0xf] }
  0x3e   : > { %v1028_v21 = vshrl.u32 %v910_v2, 16  ;;  %3392 = vmatprep.subr.bf16.mxu0 %v4108_v12  ;;  %v1020_v22 = vor.u32 %v1019_v14, %v1015_v8  ;;  %v1031_v24 = vshll.u32 %v910_v2, 16  ;;  %v1037_v25 = vshll.u32 %v911_v11, 16  ;;  %v916_v5 = vld [vmem:[%s4042_s14 + $0x48] sm:$0xf] }
  0x3f   : > { %v1041_v26 = vshrl.u32 %v911_v11, 16  ;;  %v1011_v28 = vrot.slane %v1010_v17, 4  ;;  %v1806_v29 = vsel %vm4085_vm5, %v3020_v16, %v1805_v18  ;;  %v1807_v30 = vrot.slane %v1805_v18, 4  ;;  %v917_v16 = vld [vmem:[%s4042_s14 + $0x4c] sm:$0xf] }
  0x40   : > { %3267 = vmatpush3.bf16.xpose.msra.mxu1 %v4066_v23  ;;  %v1030_v31 = vrot.slane %v1028_v21, 4  ;;  %v1021_v32 = vrot.slane %v1020_v22, 4  ;;  %v1033_v34 = vrot.slane %v1031_v24, 5  ;;  %v1039_v35 = vrot.slane %v1037_v25, 5  ;;  %v918_v21 = vld [vmem:[%s4042_s14 + $0x50] sm:$0x1] }
  0x41   : > { %3268 = vmatprep.subr.bf16.mxu1 %v4111_v13  ;;  %v1043_v36 = vrot.slane %v1041_v26, 4  ;;  %v1016_v38 = vsel %vm4072_vm4, %v1011_v28, %v1015_v8  ;;  %v1809_v39 = vsel %vm4085_vm5, %v1807_v30, %v1808_v19  ;;  %v1047_v40 = vshll.u32 %v912_v20, 16 }
  0x42   : > { %v3021_v41 = vrot.slane %v1749_v27, 9  ;;  %v1026_v42 = vsel %vm4072_vm4, %v1021_v32, %v1025_v15  ;;  %v4127_v43 = vcombine.low %v1806_v29, %v1809_v39  ;;  %v1034_v44 = vor.u32 %v1033_v34, %v1030_v31  ;;  %v1751_v27 = vld [vmem:[%s4042_s14 + $0x48] sm:$0xe]  ;;  %v919_v32 = vld [vmem:[%s4042_s14 + $0x54] sm:$0xf] }
  0x43   : > { %v1044_v45 = vor.u32 %v1043_v36, %v1039_v35  ;;  %v4131_v47 = vcombine.low %v1016_v38, %v1026_v42  ;;  %v1049_v49 = vrot.slane %v1047_v40, 5  ;;  %v1812_v51 = vrot.slane %v911_v11, 5  ;;  %v920_v38 = vld [vmem:[%s4042_s14 + $0x58] sm:$0xf]  ;;  %v4164_v39 = vld [vmem:[%s4042_s14 + $0x48] sm:$0xff]  }
  0x44   : > { %3393 = vmatpush3.bf16.xpose.msra.mxu0 %v4108_v12  ;;  %v1815_v52 = vrot.slane %v912_v20, 5  ;;  %v1035_v56 = vrot.slane %v1034_v44, 4  ;;  %v1052_v58 = vshrl.u32 %v913_v37, 16  ;;  %v1055_v59 = vshll.u32 %v913_v37, 16 }
  0x45   : > { %v1045_v57 = vrot.slane %v1044_v45, 4  ;;  %3394 = vmatprep.subr.bf16.mxu0 %v4131_v47  ;;  %v1813_v60 = vsel %vm4085_vm5, %v3021_v41, %v1812_v51  ;;  %v1814_v61 = vrot.slane %v1812_v51, 4  ;;  %v1061_v62 = vshll.u32 %v914_v46, 16 }
  0x46   : > { %v1065_v63 = vshrl.u32 %v914_v46, 16  ;;  %v1040_v0 = vsel %vm4072_vm4, %v1035_v56, %v1039_v35  ;;  %v1054_v2 = vrot.slane %v1052_v58, 4  ;;  %v1057_v3 = vrot.slane %v1055_v59, 5  ;;  %v1752_v58 = vld [vmem:[%s4042_s14 + $0x54] sm:$0xe] }
  0x47   : > { %v1050_v1 = vsel %vm4072_vm4, %v1045_v57, %v1049_v49  ;;  %v1816_v11 = vsel %vm4085_vm5, %v1814_v61, %v1815_v52  ;;  %v1063_v14 = vrot.slane %v1061_v62, 5  ;;  %v1071_v19 = vshll.u32 %v915_v54, 16  ;;  %v921_v57 = vld [vmem:[%s4042_s14 + $0x5c] sm:$0x1] }
  0x48   : > { %3269 = vmatpush3.bf16.xpose.msra.mxu1 %v4111_v13  ;;  %v4147_v8 = vcombine.low %v1040_v0, %v1050_v1  ;;  %v1067_v15 = vrot.slane %v1065_v63, 4  ;;  %v4153_v17 = vcombine.low %v1813_v60, %v1816_v11  ;;  %v1058_v18 = vor.u32 %v1057_v3, %v1054_v2 }
  0x49   : > { %3270 = vmatprep.subr.bf16.mxu1 %v4134_v48  ;;  %v3022_v20 = vrot.slane %v1750_v55, 9  ;;  %v1819_v24 = vrot.slane %v914_v46, 5  ;;  %v1822_v25 = vrot.slane %v915_v54, 5  ;;  %v1076_v26 = vshrl.u32 %v916_v5, 16 }
  0x4a   : > { %v1068_v22 = vor.u32 %v1067_v15, %v1063_v14  ;;  %v1059_v28 = vrot.slane %v1058_v18, 4  ;;  %v1073_v29 = vrot.slane %v1071_v19, 5  ;;  %v1079_v30 = vshll.u32 %v916_v5, 16  ;;  %v922_v15 = vld [vmem:[%s4042_s14 + $0x60] sm:$0xf] }
  0x4b   : > { %v1085_v31 = vshll.u32 %v917_v16, 16  ;;  %v1820_v35 = vsel %vm4085_vm5, %v3022_v20, %v1819_v24  ;;  %v1821_v36 = vrot.slane %v1819_v24, 4  ;;  %v1078_v37 = vrot.slane %v1076_v26, 4  ;;  %v4184_v20 = vld [vmem:[%s4042_s14 + $0x64] sm:$0xf]  ;;  %v4191_v26 = vld [vmem:[%s4042_s14 + $0x54] sm:$0xff]  }
  0x4c   : > { %3395 = vmatpush3.bf16.xpose.msra.mxu0 %v4131_v47  ;;  %v1069_v34 = vrot.slane %v1068_v22, 4  ;;  %v1064_v40 = vsel %vm4072_vm4, %v1059_v28, %v1063_v14  ;;  %v1081_v41 = vrot.slane %v1079_v30, 5  ;;  %v1089_v44 = vshrl.u32 %v917_v16, 16 }
  0x4d   : > { %3396 = vmatprep.subr.bf16.mxu0 %v4147_v8  ;;  %v1087_v42 = vrot.slane %v1085_v31, 5  ;;  %v1823_v46 = vsel %vm4085_vm5, %v1821_v36, %v1822_v25  ;;  %v1095_v49 = vshll.u32 %v918_v21, 16  ;;  %v3023_v51 = vrot.slane %v1751_v27, 9 }
  0x4e   : > { %v1074_v45 = vsel %vm4072_vm4, %v1069_v34, %v1073_v29  ;;  %v4174_v54 = vcombine.low %v1820_v35, %v1823_v46  ;;  %v1082_v55 = vor.u32 %v1081_v41, %v1078_v37  ;;  %v1091_v56 = vrot.slane %v1089_v44, 4 }
  0x4f   : > { %v4172_v52 = vcombine.low %v1064_v40, %v1074_v45  ;;  %v1097_v59 = vrot.slane %v1095_v49, 5  ;;  %v1826_v60 = vrot.slane %v917_v16, 5  ;;  %v1829_v61 = vrot.slane %v918_v21, 5 }
  0x50   : > { %3271 = vmatpush3.bf16.xpose.msra.mxu1 %v4134_v48  ;;  %v1100_v62 = vshrl.u32 %v919_v32, 16  ;;  %v1083_v63 = vrot.slane %v1082_v55, 4  ;;  %v1092_v0 = vor.u32 %v1091_v56, %v1087_v42  ;;  %v1103_v1 = vshll.u32 %v919_v32, 16 }
  0x51   : > { %3272 = vmatprep.subr.bf16.mxu1 %v4164_v39  ;;  %v1109_v2 = vshll.u32 %v920_v38, 16  ;;  %v1827_v3 = vsel %vm4085_vm5, %v3023_v51, %v1826_v60  ;;  %v1828_v5 = vrot.slane %v1826_v60, 4  ;;  %v1113_v14 = vshrl.u32 %v920_v38, 16  ;;  %v4217_v60 = vld [vmem:[%s4042_s14 + $0x60] sm:$0xff]  }
  0x52   : > { %v1102_v11 = vrot.slane %v1100_v62, 4  ;;  %v1093_v18 = vrot.slane %v1092_v0, 4  ;;  %v1105_v19 = vrot.slane %v1103_v1, 5  ;;  %v1119_v24 = vshll.u32 %v921_v57, 16 }
  0x53   : > { %v1111_v16 = vrot.slane %v1109_v2, 5  ;;  %v1830_v21 = vsel %vm4085_vm5, %v1828_v5, %v1829_v61  ;;  %v1115_v22 = vrot.slane %v1113_v14, 4  ;;  %v3024_v25 = vrot.slane %v1752_v58, 9  ;;  %v4212_v58 = vld [vmem:[%s4042_s14 + $0x68] sm:$0x1] }
  0x54   : > { %3397 = vmatpush3.bf16.xpose.msra.mxu0 %v4147_v8  ;;  %v4193_v27 = vcombine.low %v1827_v3, %v1830_v21  ;;  %v1106_v28 = vor.u32 %v1105_v19, %v1102_v11  ;;  %v1833_v29 = vrot.slane %v920_v38, 5  ;;  %v1088_v30 = vsel %vm4072_vm4, %v1083_v63, %v1087_v42 }
  0x55   : > { %3398 = vmatprep.subr.bf16.mxu0 %v4172_v52  ;;  %v1098_v31 = vsel %vm4072_vm4, %v1093_v18, %v1097_v59  ;;  %v1116_v32 = vor.u32 %v1115_v22, %v1111_v16  ;;  %v1836_v34 = vrot.slane %v921_v57, 5  ;;  %v1121_v35 = vrot.slane %v1119_v24, 5 }
  0x56   : > { %v1834_v36 = vsel %vm4085_vm5, %v3024_v25, %v1833_v29  ;;  %v1835_v37 = vrot.slane %v1833_v29, 4  ;;  %v1334_v40 = vshrl.u32 %v922_v15, 16  ;;  %v1107_v41 = vrot.slane %v1106_v28, 4 }
  0x57   : > { %v1337_v38 = vshll.u32 %v922_v15, 16  ;;  %v1343_v44 = vshll.u32 %v4184_v20, 16  ;;  %v1347_v42 = vshrl.u32 %v4184_v20, 16  ;;  %v4205_v45 = vcombine.low %v1088_v30, %v1098_v31  ;;  %v1746_v15 = vld [vmem:[%s4042_s14 + $0xc] sm:$0xe]  ;;  %v3767_v30 = vld [vmem:[%s4759_s1 + $0x50] sm:$0xff]  }
  0x58   : > { %3273 = vmatpush3.bf16.xpose.msra.mxu1 %v4164_v39  ;;  %v1117_v46 = vrot.slane %v1116_v32, 4  ;;  %v1837_v49 = vsel %vm4085_vm5, %v1835_v37, %v1836_v34  ;;  %v1336_v51 = vrot.slane %v1334_v40, 4  ;;  %v1112_v61 = vsel %vm4072_vm4, %v1107_v41, %v1111_v16  ;;  %v3763_v16 = vld [vmem:[%s4042_s14] sm:$0xff]   ;;  %v3768_v31 = vld [vmem:[%s4759_s1 + $0x58] sm:$0xff]   ;;  %v3766_v34 = vld [vmem:[%s4759_s1 + $0x108] sm:$0xff]  }
  0x59   : > { %3274 = vmatprep.subr.bf16.mxu1 %v4191_v26  ;;  %v4209_v55 = vcombine.low %v1834_v36, %v1837_v49  ;;  %v1339_v56 = vrot.slane %v1337_v38, 5  ;;  %v1345_v57 = vrot.slane %v1343_v44, 5  ;;  %v1349_v59 = vrot.slane %v1347_v42, 4  ;;  %v3769_v32 = vld [vmem:[%s4759_s1 + $0x60] sm:$0xff]   ;;  %v3770_v36 = vld [vmem:[%s4759_s1 + $0x68] sm:$0xff]   ;;  %v3773_v37 = vld [vmem:[%s4759_s1 + $0x70] sm:$0xff]  }
  0x5a   : > { %v1122_v62 = vsel %vm4072_vm4, %v1117_v46, %v1121_v35  ;;  %v1353_v1 = vshll.u32 %v4212_v58, 16  ;;  %v1791_v2 = vrot.slane %v4053_v9, 5  ;;  %v3018_v18 = vrot.slane %v1746_v15, 9  ;;  %v3771_v35 = vld [vmem:[%s4759_s1 + $0x110] sm:$0xff]   ;;  %v3775_v40 = vld [vmem:[%s4759_s1 + $0x120] sm:$0xff]   ;;  %v3774_v41 = vld [vmem:[%s4759_s1 + $0x78] sm:$0xff]  }
  0x5b   : > { %v1340_v63 = vor.u32 %v1339_v56, %v1336_v51  ;;  %v1350_v0 = vor.u32 %v1349_v59, %v1345_v57  ;;  %v4227_v3 = vcombine.low %v1112_v61, %v1122_v62  ;;  %v1794_v21 = vrot.slane %v4056_v10, 5  ;;  %v3764_v10 = vld [vmem:[%s4759_s1 + $0x48] sm:$0xff]   ;;  %v3777_v38 = vld [vmem:[%s4759_s1] sm:$0xff]   ;;  %v3779_v42 = vld [vmem:[%s4759_s1 + $0x130] sm:$0xff]  }
  0x5c   : > { %3399 = vmatpush3.bf16.xpose.msra.mxu0 %v4172_v52  ;;  %v1355_v14 = vrot.slane %v1353_v1, 5  ;;  %v1793_v19 = vrot.slane %v1791_v2, 4  ;;  %v1792_v24 = vsel %vm4085_vm5, %v3018_v18, %v1791_v2  ;;  %v3776_v44 = vld [vmem:[%s4759_s1 + $0x128] sm:$0xff]   ;;  %v3780_v46 = vld [vmem:[%s4759_s1 + $0x138] sm:$0xff]   ;;  %v3781_v49 = vld [vmem:[%s4759_s1 + $0x140] sm:$0xff]  }
  0x5d   : > { %3400 = vmatprep.subr.bf16.mxu0 %v4205_v45  ;;  %v1341_v5 = vrot.slane %v1340_v63, 4  ;;  %v1351_v11 = vrot.slane %v1350_v0, 4  ;;  %v925_v51 = vld [vmem:[%s4042_s14 + $0x6c] sm:$0xf]  ;;  %v4316_v56 = vld [vmem:[%s4042_s14 + $0x70] sm:$0xf] }
  0x5e   : > { %v1795_v25 = vsel %vm4085_vm5, %v1793_v19, %v1794_v21  ;;  %v1543_v59 = vshll.u32 %v925_v51, 16  ;;  %v1549_v61 = vshll.u32 %v4316_v56, 16  ;;  %v1553_v62 = vshrl.u32 %v4316_v56, 16  ;;  %v4333_v21 = vld [vmem:[%s4042_s14 + $0x4] sm:$0xf] }
  0x5f   : > { %v1346_v9 = vsel %vm4072_vm4, %v1341_v5, %v1345_v57  ;;  %v1356_v22 = vsel %vm4072_vm4, %v1351_v11, %v1355_v14  ;;  %v4243_v28 = vcombine.low %v1792_v24, %v1795_v25  ;;  %v1540_v57 = vshrl.u32 %v925_v51, 16  ;;  %v4325_v5 = vld [vmem:[%s4042_s14 + $0x74] sm:$0x1]  ;;  %v3785_v51 = vld [vmem:[%s4759_s1 + $0x20] sm:$0xff]  }
  0x60   : > { %3275 = vmatpush3.bf16.xpose.msra.mxu1 %v4191_v26  ;;  %v4245_v29 = vcombine.low %v1346_v9, %v1356_v22  ;;  %v1545_v0 = vrot.slane %v1543_v59, 5  ;;  %v1551_v1 = vrot.slane %v1549_v61, 5  ;;  %v1555_v2 = vrot.slane %v1553_v62, 4  ;;  %v3786_v59 = vld [vmem:[%s4759_s1 + $0x28] sm:$0xff]   ;;  %v3789_v61 = vld [vmem:[%s4759_s1 + $0x30] sm:$0xff]   ;;  %v3792_v62 = vld [vmem:[%s4759_s1 + $0x160] sm:$0xff]  }
  0x61   : > { %3276 = vmatprep.subr.bf16.mxu1 %v4217_v60  ;;  %v1542_v63 = vrot.slane %v1540_v57, 4  ;;  %v1559_v15 = vshll.u32 %v4325_v5, 16  ;;  %v1784_v24 = vrot.slane %v4333_v21, 5  ;;  %v2053_v25 = vrot.slane %v4184_v20, 5  ;;  %v3783_v20 = vld [vmem:[%s4759_s1 + $0x10] sm:$0xff]  }
  0x62   : > { %v1556_v14 = vor.u32 %v1555_v2, %v1551_v1  ;;  %v3787_v57 = vld [vmem:[%s4759_s1 + $0x150] sm:$0xff]   ;;  %v898_v2 = vld [vmem:[%s4042_s14] sm:$0xf] }
  0x63   : > { %v1546_v11 = vor.u32 %v1545_v0, %v1542_v63  ;;  %v3791_v63 = vld [vmem:[%s4759_s1 + $0x38] sm:$0xff]   ;;  %v3793_v0 = vld [vmem:[%s4759_s1 + $0x168] sm:$0xff]  }
  0x64   : > { %3401 = vmatpush3.bf16.xpose.msra.mxu0 %v4205_v45  ;;  %v1557_v19 = vrot.slane %v1556_v14, 4  ;;  %v932_v14 = vshrl.u32 %v898_v2, 16 }
  0x65   : > { %3402 = vmatprep.subr.bf16.mxu0 %v4227_v3  ;;  %v1547_v18 = vrot.slane %v1546_v11, 4  ;;  %v3797_v11 = vld [vmem:[%s4759_s1 + $0x178] sm:$0xff]  }
  0x67   : > { %v1552_v9 = vsel %vm4072_vm4, %v1547_v18, %v1551_v1  ;;  %v3796_v1 = vld [vmem:[%s4759_s1 + $0x170] sm:$0xff]   ;;  %v941_v18 = vshll.u32 %v4333_v21, 16 }
  0x68   : > { %3277 = vmatpush3.bf16.xpose.msra.mxu1 %v4217_v60 }
  0x69   : > { %3294 = vmatprep.subr.bf16.mxu1 %v3763_v16 }
  0x6c   : > { %3403 = vmatpush3.bf16.xpose.msra.mxu0 %v4227_v3 }
  0x6d   : > { %3404 = vmatprep.subr.bf16.mxu0 %v4245_v29 }
  0x6f   : > { %3279 = vmatmul.mubr.bf16.vlgmr.msra.gmra.mrb[0].mxu1 %v3764_v10  ;;  %v4344_v10 = vld [vmem:[%s4042_s14 + $0x8] sm:$0x1] }
  0x70   : > { %3295 = vmatpush3.bf16.xpose.msra.mxu1 %v3763_v16  ;;  %3282 = vmatprep.mubr.bf16.mxu1 %v3767_v30  ;;  %v1561_v16 = vrot.slane %v1559_v15, 5  ;;  %v1745_v30 = vld [vmem:[%s4042_s14] sm:$0xe]  ;;  %v935_v15 = vshll.u32 %v898_v2, 16  ;;  %v2441_v2 = vld [vmem:[%s4760_s2 + $0x48] sm:$0xff] }
  0x71   : > { %3296 = vmatprep.subr.bf16.mxu1 %v4045_v6 }
  0x72   : > { %v1562_v22 = vsel %vm4072_vm4, %v1557_v19, %v1561_v16  ;;  %v945_v19 = vshrl.u32 %v4333_v21, 16  ;;  %v937_v16 = vrot.slane %v935_v15, 5  ;;  %v3790_v21 = vld [vmem:[%s4042_s14 + $0x6c] sm:$0xff]  }
  0x73   : > { %v3817_v15 = vld [vmem:[%s4759_s1 + $0x1c8] sm:$0xff]  }
  0x74   : > { %3405 = vmatpush3.bf16.xpose.msra.mxu0 %v4245_v29 }
  0x75   : > { %3422 = vmatprep.subr.bf16.mxu0 %v4108_v12 }
  0x77   : > { %3283 = vmatmul.mubr.bf16.gmra.mrb[4].mxu1 %v3768_v31  ;;  %v3016_v31 = vcombine.low %v1552_v9, %v1562_v22  ;;  %v943_v9 = vrot.slane %v941_v18, 5  ;;  %v947_v22 = vrot.slane %v945_v19, 4  ;;  %v3820_v18 = vld [vmem:[%s4759_s1 + $0x1d0] sm:$0xff]   ;;  %v3819_v19 = vld [vmem:[%s4759_s1 + $0xe8] sm:$0xff]  }
  0x78   : > { %3297 = vmatpush3.bf16.xpose.msra.mxu1 %v4045_v6  ;;  %3286 = vmatprep.mubr.bf16.mxu1 %v3769_v32  ;;  %v3772_v6 = vld [vmem:[%s4759_s1 + $0x118] sm:$0xff]   ;;  %v3017_v32 = vrot.slane %v1745_v30, 9  ;;  %v951_v30 = vshll.u32 %v4344_v10, 16 }
  0x79   : > { %3298 = vmatprep.subr.bf16.mxu1 %v4048_v7 }
  0x7b   : > { %3407 = vmatmul.mubr.bf16.vlgmr.msra.gmra.mrb[0].mxu0 %v3766_v34  ;;  %v1786_v34 = vrot.slane %v1784_v24, 4 }
  0x7c   : > { %3423 = vmatpush3.bf16.xpose.msra.mxu0 %v4108_v12  ;;  %3410 = vmatprep.mubr.bf16.mxu0 %v3771_v35  ;;  %v1787_v35 = vrot.slane %v4344_v10, 5 }
  0x7d   : > { %3424 = vmatprep.subr.bf16.mxu0 %v4131_v47 }
  0x7f   : > { %3287 = vmatmul.mubr.bf16.gmra.mrb[8].mxu1 %v3770_v36  ;;  %v2055_v36 = vrot.slane %v2053_v25, 4 }
  0x80   : > { %3299 = vmatpush3.bf16.xpose.msra.mxu1 %v4048_v7  ;;  %3290 = vmatprep.mubr.bf16.mxu1 %v3773_v37  ;;  %v2056_v37 = vrot.slane %v4212_v58, 5 }
  0x81   : > { %3300 = vmatprep.subr.bf16.mxu1 %v4066_v23 }
  0x82   : > { %v2057_v58 = vsel %vm4085_vm5, %v2055_v36, %v2056_v37  ;;  %v3795_v36 = vld [vmem:[%s4759_s1 + $0x88] sm:$0xff]   ;;  %v3802_v37 = vld [vmem:[%s4759_s1 + $0xa0] sm:$0xff]  }
  0x83   : > { %3411 = vmatmul.mubr.bf16.gmra.mrb[4].mxu0 %v3772_v6  ;;  %v3778_v6 = vld [vmem:[%s4759_s1 + $0x8] sm:$0xff]  }
  0x84   : > { %3425 = vmatpush3.bf16.xpose.msra.mxu0 %v4131_v47  ;;  %3414 = vmatprep.mubr.bf16.mxu0 %v3775_v40  ;;  %v1753_v40 = vld [vmem:[%s4042_s14 + $0x60] sm:$0xe] }
  0x85   : > { %3426 = vmatprep.subr.bf16.mxu0 %v4147_v8 }
  0x87   : > { %3291 = vmatmul.mubr.bf16.gmra.mrb[12].mxu1 %v3774_v41  ;;  %v1785_v41 = vsel %vm4085_vm5, %v3017_v32, %v1784_v24 }
  0x88   : > { %3301 = vmatpush3.bf16.xpose.msra.mxu1 %v4066_v23  ;;  %3310 = vmatprep.mubr.bf16.mxu1 %v3777_v38  ;;  %v1788_v38 = vsel %vm4085_vm5, %v1786_v34, %v1787_v35  ;;  %v953_v34 = vrot.slane %v951_v30, 5  ;;  %v3831_v30 = vld [vmem:[%s4759_s1 + $0x200] sm:$0xff]  }
  0x89   : > { %3302 = vmatprep.subr.bf16.mxu1 %v4111_v13 }
  0x8b   : > { %3415 = vmatmul.mubr.bf16.gmra.mrb[8].mxu0 %v3776_v44  ;;  %v3057_v44 = vrot.slane %v1753_v40, 9  ;;  %v3803_v40 = vld [vmem:[%s4759_s1 + $0xa8] sm:$0xff]  }
  0x8c   : > { %3427 = vmatpush3.bf16.xpose.msra.mxu0 %v4147_v8  ;;  %3418 = vmatprep.mubr.bf16.mxu0 %v3779_v42  ;;  %v3049_v42 = vcombine.low %v1785_v41, %v1788_v38  ;;  %v3806_v41 = vld [vmem:[%s4759_s1 + $0xb0] sm:$0xff]   ;;  %v3808_v38 = vld [vmem:[%s4759_s1 + $0x1a0] sm:$0xff]  }
  0x8d   : > { %3428 = vmatprep.subr.bf16.mxu0 %v4172_v52 }
  0x90   : > { %3303 = vmatpush3.bf16.xpose.msra.mxu1 %v4111_v13 }
  0x91   : > { %3304 = vmatprep.subr.bf16.mxu1 %v4134_v48 }
  0x93   : > { %3419 = vmatmul.mubr.bf16.gmra.mrb[12].mxu0 %v3780_v46 }
  0x94   : > { %3429 = vmatpush3.bf16.xpose.msra.mxu0 %v4172_v52  ;;  %3438 = vmatprep.mubr.bf16.mxu0 %v3781_v49  ;;  %v3784_v49 = vld [vmem:[%s4759_s1 + $0x18] sm:$0xff]  }
  0x95   : > { %3430 = vmatprep.subr.bf16.mxu0 %v4205_v45 }
  0x98   : > { %3305 = vmatpush3.bf16.xpose.msra.mxu1 %v4134_v48 }
  0x99   : > { %3306 = vmatprep.subr.bf16.mxu1 %v4164_v39 }
  0x9c   : > { %3431 = vmatpush3.bf16.xpose.msra.mxu0 %v4205_v45 }
  0x9d   : > { %3432 = vmatprep.subr.bf16.mxu0 %v4227_v3 }
  0xa0   : > { %3307 = vmatpush3.bf16.xpose.msra.mxu1 %v4164_v39 }
  0xa1   : > { %3308 = vmatprep.subr.bf16.mxu1 %v4191_v26 }
  0xa4   : > { %3433 = vmatpush3.bf16.xpose.msra.mxu0 %v4227_v3 }
  0xa5   : > { %3434 = vmatprep.subr.bf16.mxu0 %v4245_v29 }
  0xa8   : > { %3309 = vmatpush3.bf16.xpose.msra.mxu1 %v4191_v26 }
  0xa9   : > { %3326 = vmatprep.subr.bf16.mxu1 %v4048_v7 }
  0xac   : > { %3435 = vmatpush3.bf16.xpose.msra.mxu0 %v4245_v29  ;;  %v2054_v29 = vsel %vm4085_vm5, %v3057_v44, %v2053_v25  ;;  %v948_v25 = vor.u32 %v947_v22, %v943_v9  ;;  %v2432_v44 = vld [vmem:[%s4760_s2] sm:$0xff] }
  0xad   : > { %3436 = vmatprep.subr.bf16.mxu0 %v3016_v31  ;;  %v4369_v46 = vcombine.low %v2054_v29, %v2057_v58  ;;  %v2434_v58 = vld [vmem:[%s4760_s2 + $0x10] sm:$0xff]  ;;  %v3932_v29 = vmov 0   ;;  %v3828_v22 = vld [vmem:[%s4759_s1 + $0x220] sm:$0xff]  }
  0xae   : > { %v949_v32 = vrot.slane %v948_v25, 4  ;;  %3752 = vset.pattern.permute.xlu0 %v3932_v29  ;;  %3753 = vset.pattern.permute.xlu1 %v3932_v29  ;;  %v3826_v25 = vld [vmem:[%s4759_s1 + $0x1f0] sm:$0xff]  }
  0xaf   : > { %3311 = vmatmul.mubr.bf16.vlgmr.msra.gmra.mrb[0].mxu1 %v3778_v6  ;;  %v3799_v6 = vld [vmem:[%s4759_s1 + $0x188] sm:$0xff]   ;;  %2450 = vperm.xlu0 %3752, %v2432_v44  }
  0xb0   : > { %3327 = vmatpush3.bf16.xpose.msra.mxu1 %v4048_v7  ;;  %3314 = vmatprep.mubr.bf16.mxu1 %v3783_v20  ;;  %v3782_v7 = vld [vmem:[%s4759_s1 + $0x148] sm:$0xff]   ;;  %v954_v35 = vsel %vm4072_vm4, %v949_v32, %v953_v34  ;;  %v3804_v20 = vld [vmem:[%s4759_s1 + $0x190] sm:$0xff]  }
  0xb1   : > { %3328 = vmatprep.subr.bf16.mxu1 %v4066_v23  ;;  %2460 = vperm.xlu1 %3753, %v2434_v58  }
  0xb4   : > { %3437 = vmatpush3.bf16.xpose.msra.mxu0 %v3016_v31 }
  0xb5   : > { %3454 = vmatprep.subr.bf16.mxu0 %v3049_v42 }
  0xb7   : > { %3315 = vmatmul.mubr.bf16.gmra.mrb[4].mxu1 %v3784_v49  ;;  %v2433_v49 = vld [vmem:[%s4760_s2 + $0x8] sm:$0xff] }
  0xb8   : > { %3329 = vmatpush3.bf16.xpose.msra.mxu1 %v4066_v23  ;;  %3318 = vmatprep.mubr.bf16.mxu1 %v3785_v51  ;;  %v3788_v23 = vld [vmem:[%s4759_s1 + $0x158] sm:$0xff]   ;;  %v3812_v51 = vld [vmem:[%s4759_s1 + $0x1b0] sm:$0xff]  }
  0xb9   : > { %3330 = vmatprep.subr.bf16.mxu1 %v4111_v13  ;;  %2455 = vperm.xlu0 %3752, %v2433_v49  }
  0xbb   : > { %3439 = vmatmul.mubr.bf16.vlgmr.msra.gmra.mrb[0].mxu0 %v3782_v7  ;;  %v2435_v7 = vld [vmem:[%s4760_s2 + $0x18] sm:$0xff] }
  0xbc   : > { %3455 = vmatpush3.bf16.xpose.msra.mxu0 %v3049_v42  ;;  %3442 = vmatprep.mubr.bf16.mxu0 %v3787_v57  ;;  %v3809_v42 = vld [vmem:[%s4759_s1 + $0x1a8] sm:$0xff]   ;;  %v2436_v57 = vld [vmem:[%s4760_s2 + $0x20] sm:$0xff] }
  0xbd   : > { %3456 = vmatprep.subr.bf16.mxu0 %v4243_v28  ;;  %2465 = vperm.xlu1 %3753, %v2435_v7  }
  0xbe   : > { %2470 = vperm.xlu0 %3752, %v2436_v57  }
  0xbf   : > { %3319 = vmatmul.mubr.bf16.gmra.mrb[8].mxu1 %v3786_v59  ;;  %v3813_v59 = vld [vmem:[%s4759_s1 + $0x1b8] sm:$0xff]  }
  0xc0   : > { %3331 = vmatpush3.bf16.xpose.msra.mxu1 %v4111_v13  ;;  %3322 = vmatprep.mubr.bf16.mxu1 %v3789_v61  ;;  %v3794_v13 = vld [vmem:[%s4759_s1 + $0x80] sm:$0xff]   ;;  %v2438_v61 = vld [vmem:[%s4760_s2 + $0x30] sm:$0xff] }
  0xc1   : > { %3332 = vmatprep.subr.bf16.mxu1 %v4134_v48 }
  0xc2   : > { %2480 = vperm.xlu0 %3752, %v2438_v61  }
  0xc3   : > { %3443 = vmatmul.mubr.bf16.gmra.mrb[4].mxu0 %v3788_v23  ;;  %v3816_v23 = vld [vmem:[%s4759_s1 + $0x1c0] sm:$0xff]  }
  0xc4   : > { %3457 = vmatpush3.bf16.xpose.msra.mxu0 %v4243_v28  ;;  %3446 = vmatprep.mubr.bf16.mxu0 %v3792_v62  ;;  %v2439_v62 = vld [vmem:[%s4760_s2 + $0x38] sm:$0xff] }
  0xc5   : > { %3458 = vmatprep.subr.bf16.mxu0 %v4105_v4 }
  0xc7   : > { %3323 = vmatmul.mubr.bf16.gmra.mrb[12].mxu1 %v3791_v63  ;;  %v2444_v63 = vld [vmem:[%s4760_s2 + $0x60] sm:$0xff] }
  0xc8   : > { %3333 = vmatpush3.bf16.xpose.msra.mxu1 %v4134_v48  ;;  %3342 = vmatprep.mubr.bf16.mxu1 %v3794_v13  ;;  %v3798_v48 = vld [vmem:[%s4759_s1 + $0x180] sm:$0xff]   ;;  %v2446_v13 = vld [vmem:[%s4760_s2 + $0x70] sm:$0xff] }
  0xc9   : > { %3334 = vmatprep.subr.bf16.mxu1 %v4164_v39  ;;  %2510 = vperm.xlu0 %3752, %v2444_v63  }
  0xcb   : > { %3447 = vmatmul.mubr.bf16.gmra.mrb[8].mxu0 %v3793_v0  ;;  %v2447_v0 = vld [vmem:[%s4760_s2 + $0x78] sm:$0xff] }
  0xcc   : > { %3459 = vmatpush3.bf16.xpose.msra.mxu0 %v4105_v4  ;;  %3450 = vmatprep.mubr.bf16.mxu0 %v3796_v1  ;;  %v2440_v1 = vld [vmem:[%s4760_s2 + $0x40] sm:$0xff] }
  0xcd   : > { %3460 = vmatprep.subr.bf16.mxu0 %v4127_v43  ;;  %2520 = vperm.xlu0 %3752, %v2446_v13  }
  0xd0   : > { %3335 = vmatpush3.bf16.xpose.msra.mxu1 %v4164_v39  ;;  %v934_v39 = vrot.slane %v932_v14, 4  ;;  %v3818_v14 = vld [vmem:[%s4759_s1 + $0xe0] sm:$0xff]  }
  0xd1   : > { %3336 = vmatprep.subr.bf16.mxu1 %v4191_v26  ;;  %2490 = vperm.xlu0 %3752, %v2440_v1  }
  0xd2   : > { %v938_v24 = vor.u32 %v937_v16, %v934_v39  ;;  %v3822_v39 = vld [vmem:[%s4759_s1 + $0xf0] sm:$0xff]   ;;  %v3821_v16 = vld [vmem:[%s4759_s1 + $0x1d8] sm:$0xff]  }
  0xd3   : > { %3451 = vmatmul.mubr.bf16.gmra.mrb[12].mxu0 %v3797_v11  ;;  %v2443_v11 = vld [vmem:[%s4760_s2 + $0x58] sm:$0xff] }
  0xd4   : > { %3461 = vmatpush3.bf16.xpose.msra.mxu0 %v4127_v43  ;;  %3470 = vmatprep.mubr.bf16.mxu0 %v3798_v48  ;;  %v939_v31 = vrot.slane %v938_v24, 4  ;;  %v3814_v48 = vld [vmem:[%s4759_s1 + $0xd0] sm:$0xff]   ;;  %v3825_v24 = vld [vmem:[%s4759_s1 + $0x1e8] sm:$0xff]  }
  0xd5   : > { %3462 = vmatprep.subr.bf16.mxu0 %v4153_v17 }
  0xd8   : > { %3337 = vmatpush3.bf16.xpose.msra.mxu1 %v4191_v26  ;;  %v944_v26 = vsel %vm4072_vm4, %v939_v31, %v943_v9  ;;  %v3824_v9 = vld [vmem:[%s4759_s1 + $0x1e0] sm:$0xff]   ;;  %v1754_v31 = vld [vmem:[%s4042_s14 + $0x6c] sm:$0xe]  ;;  %s4712_s14 = scalar_lea.vmem [#allocation4], %s4708_s27 }
  0xd9   : > { %3338 = vmatprep.subr.bf16.mxu1 %v4217_v60  ;;  %v2959_v10 = vcombine.low %v944_v26, %v954_v35  ;;  %v3083_v32 = vrot.slane %v1754_v31, 9  ;;  %v3835_v35 = vld [vmem:[%s4759_s1 + $0x218] sm:$0xff]  }
  0xdc   : > { %3463 = vmatpush3.bf16.xpose.msra.mxu0 %v4153_v17 }
  0xdd   : > { %3464 = vmatprep.subr.bf16.mxu0 %v4174_v54 }
  0xe0   : > { %3339 = vmatpush3.bf16.xpose.msra.mxu1 %v4217_v60  ;;  %v3800_v60 = vld [vmem:[%s4759_s1 + $0x90] sm:$0xff]  }
  0xe1   : > { %3340 = vmatprep.subr.bf16.mxu1 %v3790_v21 }
  0xe4   : > { %3465 = vmatpush3.bf16.xpose.msra.mxu0 %v4174_v54 }
  0xe5   : > { %3466 = vmatprep.subr.bf16.mxu0 %v4193_v27 }
  0xe8   : > { %3341 = vmatpush3.bf16.xpose.msra.mxu1 %v3790_v21  ;;  %v2245_v21 = vrot.slane %v4316_v56, 5 }
  0xe9   : > { %3358 = vmatprep.subr.bf16.mxu1 %v2959_v10 }
  0xea   : > { %v2247_v34 = vrot.slane %v2245_v21, 4  ;;  %v2246_v26 = vsel %vm4085_vm5, %v3083_v32, %v2245_v21 }
  0xec   : > { %3467 = vmatpush3.bf16.xpose.msra.mxu0 %v4193_v27 }
  0xed   : > { %3468 = vmatprep.subr.bf16.mxu0 %v4209_v55 }
  0xef   : > { %3343 = vmatmul.mubr.bf16.vlgmr.msra.gmra.mrb[0].mxu1 %v3795_v36 }
  0xf0   : > { %3359 = vmatpush3.bf16.xpose.msra.mxu1 %v2959_v10  ;;  %3346 = vmatprep.mubr.bf16.mxu1 %v3800_v60 }
  0xf1   : > { %3360 = vmatprep.subr.bf16.mxu1 %v4090_v53 }
  0xf4   : > { %3469 = vmatpush3.bf16.xpose.msra.mxu0 %v4209_v55 }
  0xf5   : > { %3486 = vmatprep.subr.bf16.mxu0 %v4243_v28 }
  0xf7   : > { %3347 = vmatmul.mubr.bf16.gmra.mrb[4].mxu1 %v3801_v33 }
  0xf8   : > { %3361 = vmatpush3.bf16.xpose.msra.mxu1 %v4090_v53  ;;  %3350 = vmatprep.mubr.bf16.mxu1 %v3802_v37  ;;  %v3805_v53 = vld [vmem:[%s4759_s1 + $0x198] sm:$0xff]  }
  0xf9   : > { %3362 = vmatprep.subr.bf16.mxu1 %v4108_v12 }
  0xfb   : > { %3471 = vmatmul.mubr.bf16.vlgmr.msra.gmra.mrb[0].mxu0 %v3799_v6 }
  0xfc   : > { %3487 = vmatpush3.bf16.xpose.msra.mxu0 %v4243_v28  ;;  %3474 = vmatprep.mubr.bf16.mxu0 %v3804_v20  ;;  %v3807_v28 = vld [vmem:[%s4759_s1 + $0xb8] sm:$0xff]  }
  0xfd   : > { %3488 = vmatprep.subr.bf16.mxu0 %v4105_v4 }
  0xff   : > { %3351 = vmatmul.mubr.bf16.gmra.mrb[8].mxu1 %v3803_v40 }
 0x100   : > { %3363 = vmatpush3.bf16.xpose.msra.mxu1 %v4108_v12  ;;  %3354 = vmatprep.mubr.bf16.mxu1 %v3806_v41  ;;  %v3810_v12 = vld [vmem:[%s4759_s1 + $0xc0] sm:$0xff]  }
 0x101   : > { %3364 = vmatprep.subr.bf16.mxu1 %v4131_v47 }
 0x103   : > { %3475 = vmatmul.mubr.bf16.gmra.mrb[4].mxu0 %v3805_v53 }
 0x104   : > { %3489 = vmatpush3.bf16.xpose.msra.mxu0 %v4105_v4  ;;  %3478 = vmatprep.mubr.bf16.mxu0 %v3808_v38 }
 0x105   : > { %3490 = vmatprep.subr.bf16.mxu0 %v4127_v43 }
 0x107   : > { %3355 = vmatmul.mubr.bf16.gmra.mrb[12].mxu1 %v3807_v28 }
 0x108   : > { %3365 = vmatpush3.bf16.xpose.msra.mxu1 %v4131_v47  ;;  %3374 = vmatprep.mubr.bf16.mxu1 %v3810_v12  ;;  %v2437_v47 = vld [vmem:[%s4760_s2 + $0x28] sm:$0xff] }
 0x109   : > { %3366 = vmatprep.subr.bf16.mxu1 %v4147_v8  ;;  %2475 = vperm.xlu1 %3753, %v2437_v47  }
 0x10b   : > { %3479 = vmatmul.mubr.bf16.gmra.mrb[8].mxu0 %v3809_v42 }
 0x10c   : > { %3491 = vmatpush3.bf16.xpose.msra.mxu0 %v4127_v43  ;;  %3482 = vmatprep.mubr.bf16.mxu0 %v3812_v51 }
 0x10d   : > { %3492 = vmatprep.subr.bf16.mxu0 %v4153_v17  ;;  %2485 = vperm.xlu1 %3753, %v2439_v62  }
 0x110   : > { %3367 = vmatpush3.bf16.xpose.msra.mxu1 %v4147_v8  ;;  %v2445_v8 = vld [vmem:[%s4760_s2 + $0x68] sm:$0xff] }
 0x111   : > { %3368 = vmatprep.subr.bf16.mxu1 %v4172_v52  ;;  %2515 = vperm.xlu1 %3753, %v2445_v8  }
 0x113   : > { %3483 = vmatmul.mubr.bf16.gmra.mrb[12].mxu0 %v3813_v59 }
 0x114   : > { %3493 = vmatpush3.bf16.xpose.msra.mxu0 %v4153_v17  ;;  %3502 = vmatprep.mubr.bf16.mxu0 %v3816_v23 }
 0x115   : > { %3494 = vmatprep.subr.bf16.mxu0 %v4174_v54  ;;  %2525 = vperm.xlu1 %3753, %v2447_v0  }
 0x118   : > { %3369 = vmatpush3.bf16.xpose.msra.mxu1 %v4172_v52  ;;  %v2442_v52 = vld [vmem:[%s4760_s2 + $0x50] sm:$0xff] }
 0x119   : > { %3370 = vmatprep.subr.bf16.mxu1 %v4205_v45  ;;  %2495 = vperm.xlu1 %3753, %v2441_v2  }
 0x11a   : > { %2500 = vperm.xlu0 %3752, %v2442_v52  }
 0x11c   : > { %3495 = vmatpush3.bf16.xpose.msra.mxu0 %v4174_v54 }
 0x11d   : > { %3496 = vmatprep.subr.bf16.mxu0 %v4193_v27  ;;  %2505 = vperm.xlu1 %3753, %v2443_v11  }
 0x120   : > { %3371 = vmatpush3.bf16.xpose.msra.mxu1 %v4205_v45  ;;  %v3811_v45 = vld [vmem:[%s4759_s1 + $0xc8] sm:$0xff]  }
 0x121   : > { %3372 = vmatprep.subr.bf16.mxu1 %v4227_v3 }
 0x124   : > { %3497 = vmatpush3.bf16.xpose.msra.mxu0 %v4193_v27 }
 0x125   : > { %3498 = vmatprep.subr.bf16.mxu0 %v4209_v55 }
 0x128   : > { %3373 = vmatpush3.bf16.xpose.msra.mxu1 %v4227_v3  ;;  %v3815_v3 = vld [vmem:[%s4759_s1 + $0xd8] sm:$0xff]  }
 0x129   : > { %3550 = vmatprep.subr.bf16.mxu1 %v4105_v4 }
 0x12c   : > { %3499 = vmatpush3.bf16.xpose.msra.mxu0 %v4209_v55 }
 0x12d   : > { %3500 = vmatprep.subr.bf16.mxu0 %v4369_v46 }
 0x12e   : > { %v2451_v52 = vpop.permute.xlu0 %2450 }
 0x12f   : > { %3375 = vmatmul.mubr.bf16.vlgmr.msra.gmra.mrb[0].mxu1 %v3811_v45 }
 0x130   : > { %3558 = vmatpush3.bf16.xpose.msra.mxu1 %v4105_v4  ;;  %3378 = vmatprep.mubr.bf16.mxu1 %v3814_v48  ;;  %v2461_v11 = vpop.permute.xlu1 %2460 }
 0x131   : > { %3551 = vmatprep.subr.bf16.mxu1 %v4127_v43 }
 0x134   : > { %3501 = vmatpush3.bf16.xpose.msra.mxu0 %v4369_v46 }
 0x135   : > { %3518 = vmatprep.subr.bf16.mxu0 %v4105_v4 }
 0x137   : > { %3379 = vmatmul.mubr.bf16.gmra.mrb[4].mxu1 %v3815_v3 }
 0x138   : > { %3559 = vmatpush3.bf16.xpose.msra.mxu1 %v4127_v43  ;;  %3382 = vmatprep.mubr.bf16.mxu1 %v3818_v14  ;;  %v2456_v45 = vpop.permute.xlu0 %2455 }
 0x139   : > { %3552 = vmatprep.subr.bf16.mxu1 %v4153_v17 }
 0x13b   : > { %3503 = vmatmul.mubr.bf16.vlgmr.msra.gmra.mrb[0].mxu0 %v3817_v15 }
 0x13c   : > { %3519 = vmatpush3.bf16.xpose.msra.mxu0 %v4105_v4  ;;  %3506 = vmatprep.mubr.bf16.mxu0 %v3820_v18  ;;  %v3823_v4 = vld [vmem:[%s4759_s1 + $0xf8] sm:$0xff]   ;;  %v2466_v48 = vpop.permute.xlu1 %2465 }
 0x13d   : > { %3520 = vmatprep.subr.bf16.mxu0 %v4127_v43  ;;  %v2471_v3 = vpop.permute.xlu0 %2470 }
 0x13f   : > { %3383 = vmatmul.mubr.bf16.gmra.mrb[8].mxu1 %v3819_v19 }
 0x140   : > { %3560 = vmatpush3.bf16.xpose.msra.mxu1 %v4153_v17  ;;  %3386 = vmatprep.mubr.bf16.mxu1 %v3822_v39 }
 0x141   : > { %3553 = vmatprep.subr.bf16.mxu1 %v4174_v54 }
 0x143   : > { %3507 = vmatmul.mubr.bf16.gmra.mrb[4].mxu0 %v3821_v16 }
 0x144   : > { %3521 = vmatpush3.bf16.xpose.msra.mxu0 %v4127_v43  ;;  %3510 = vmatprep.mubr.bf16.mxu0 %v3824_v9  ;;  %v3827_v43 = vld [vmem:[%s4759_s1 + $0x1f8] sm:$0xff]   ;;  %v2481_v9 = vpop.permute.xlu0 %2480 }
 0x145   : > { %3522 = vmatprep.subr.bf16.mxu0 %v4153_v17 }
 0x147   : > { %3387 = vmatmul.mubr.bf16.gmra.mrb[12].mxu1 %v3823_v4 }
 0x148   : > { %3561 = vmatpush3.bf16.xpose.msra.mxu1 %v4174_v54  ;;  %3542 = vmatprep.mubr.bf16.mxu1 %v3828_v22 }
 0x149   : > { %3554 = vmatprep.subr.bf16.mxu1 %v4193_v27 }
 0x14b   : > { %3511 = vmatmul.mubr.bf16.gmra.mrb[8].mxu0 %v3825_v24 }
 0x14c   : > { %3523 = vmatpush3.bf16.xpose.msra.mxu0 %v4153_v17  ;;  %3514 = vmatprep.mubr.bf16.mxu0 %v3826_v25  ;;  %v2248_v17 = vrot.slane %v4325_v5, 5  ;;  %v3829_v5 = vld [vmem:[%s4759_s1 + $0x228] sm:$0xff]  }
 0x14d   : > { %3524 = vmatprep.subr.bf16.mxu0 %v4174_v54 }
 0x14e   : > { %v2249_v56 = vsel %vm4085_vm5, %v2247_v34, %v2248_v17 }
 0x150   : > { %3562 = vmatpush3.bf16.xpose.msra.mxu1 %v4193_v27 }
 0x151   : > { %3555 = vmatprep.subr.bf16.mxu1 %v4209_v55 }
 0x153   : > { %3515 = vmatmul.mubr.bf16.gmra.mrb[12].mxu0 %v3827_v43 }
 0x154   : > { %3525 = vmatpush3.bf16.xpose.msra.mxu0 %v4174_v54  ;;  %3534 = vmatprep.mubr.bf16.mxu0 %v3831_v30  ;;  %v3108_v54 = vcombine.low %v2246_v26, %v2249_v56  ;;  %v2511_v30 = vpop.permute.xlu0 %2510 }
 0x155   : > { %3526 = vmatprep.subr.bf16.mxu0 %v4193_v27 }
 0x158   : > { %3563 = vmatpush3.bf16.xpose.msra.mxu1 %v4209_v55 }
 0x159   : > { %3556 = vmatprep.subr.bf16.mxu1 %v4369_v46 }
 0x15c   : > { %3527 = vmatpush3.bf16.xpose.msra.mxu0 %v4193_v27  ;;  %v3832_v27 = vld [vmem:[%s4759_s1 + $0x238] sm:$0xff]  }
 0x15d   : > { %3528 = vmatprep.subr.bf16.mxu0 %v4209_v55 }
 0x160   : > { %3564 = vmatpush3.bf16.xpose.msra.mxu1 %v4369_v46 }
 0x161   : > { %3557 = vmatprep.subr.bf16.mxu1 %v3108_v54 }
 0x164   : > { %3529 = vmatpush3.bf16.xpose.msra.mxu0 %v4209_v55  ;;  %v3833_v55 = vld [vmem:[%s4759_s1 + $0x208] sm:$0xff]  }
 0x165   : > { %3530 = vmatprep.subr.bf16.mxu0 %v4369_v46 }
 0x168   : > { %3565 = vmatpush3.bf16.xpose.msra.mxu1 %v3108_v54 }
 0x16c   : > { %3531 = vmatpush3.bf16.xpose.msra.mxu0 %v4369_v46  ;;  %v3834_v46 = vld [vmem:[%s4759_s1 + $0x210] sm:$0xff]  }
 0x16d   : > { %3532 = vmatprep.subr.bf16.mxu0 %v3108_v54 }
 0x16f   : > { %3543 = vmatmul.mubr.bf16.vlgmr.msra.gmra.mrb[16].mxu1 %v3829_v5 }
 0x170   : > { %3546 = vmatprep.mubr.bf16.mxu1 %v3830_v50 }
 0x174   : > { %3533 = vmatpush3.bf16.xpose.msra.mxu0 %v3108_v54 }
 0x177   : > { %3547 = vmatmul.mubr.bf16.gmra.mrb[20].mxu1 %v3832_v27 }
 0x17b   : > { %3535 = vmatmul.mubr.bf16.vlgmr.msra.gmra.mrb[0].mxu0 %v3833_v55 }
 0x17c   : > { %3538 = vmatprep.mubr.bf16.mxu0 %v3834_v46 }
 0x183   : > { %3539 = vmatmul.mubr.bf16.gmra.mrb[4].mxu0 %v3835_v35  ;;  %v2521_v35 = vpop.permute.xlu0 %2520 }
 0x188   : > { %v4686_v14 = vpop.permute.xlu1 %2475 }
 0x18c   : > { %v2486_v25 = vpop.permute.xlu1 %2485 }
 0x190   : > { %v2516_v34 = vpop.permute.xlu1 %2515 }
 0x202   : > { %v3376_v10 = vpop.f32.mrb[0].mxu1 }
 0x203   : > { %v1254_v36 = vpop.f32.mrb[1].mxu1 }
 0x204   : > { %v4674_v60 = vpop.f32.mrb[2].mxu1 }
 0x205   : > { %v4676_v33 = vpop.f32.mrb[3].mxu1 }
 0x20a   : > { %v4678_v37 = vpop.f32.mrb[4].mxu1 }
 0x20b   : > { %v4680_v6 = vpop.f32.mrb[5].mxu1 }
 0x20c   : > { %v4682_v20 = vpop.f32.mrb[6].mxu1 }
 0x20d   : > { %v4684_v40 = vpop.f32.mrb[7].mxu1 }
 0x212   : > { %v3384_v41 = vpop.f32.mrb[8].mxu1 }
 0x213   : > { %v1286_v53 = vpop.f32.mrb[9].mxu1 }
 0x214   : > { %v3385_v38 = vpop.f32.mrb[10].mxu1 }
 0x215   : > { %v1289_v28 = vpop.f32.mrb[11].mxu1 }
 0x21a   : > { %v3388_v44 = vpop.f32.mrb[12].mxu1 }
 0x21b   : > { %v1302_v12 = vpop.f32.mrb[13].mxu1 }
 0x21c   : > { %v3389_v58 = vpop.f32.mrb[14].mxu1 }
 0x21d   : > { %v1305_v29 = vpop.f32.mrb[15].mxu1 }
 0x21e   : > { %v3512_v42 = vpop.f32.mrb[8].mxu0 }
 0x21f   : > { %v3574_v49 = vadd.f32 %v3512_v42, %v3384_v41  ;;  %v2193_v51 = vpop.f32.mrb[9].mxu0 }
 0x220   : > { %v3576_v7 = vadd.f32 %v2193_v51, %v1286_v53  ;;  %v3513_v57 = vpop.f32.mrb[10].mxu0 }
 0x221   : > { %v3578_v47 = vadd.f32 %v3513_v57, %v3385_v38  ;;  %v2196_v59 = vpop.f32.mrb[11].mxu0 }
 0x222   : > { %v3580_v61 = vadd.f32 %v2196_v59, %v1289_v28 }
 0x226   : > { %v3516_v23 = vpop.f32.mrb[12].mxu0 }
 0x227   : > { %v3582_v62 = vadd.f32 %v3516_v23, %v3388_v44  ;;  %v2209_v63 = vpop.f32.mrb[13].mxu0 }
 0x228   : > { %v3584_v8 = vadd.f32 %v2209_v63, %v1302_v12  ;;  %v3517_v13 = vpop.f32.mrb[14].mxu0  ;;  %v2526_v12 = vpop.permute.xlu1 %2525 }
 0x229   : > { %v3586_v0 = vadd.f32 %v3517_v13, %v3389_v58  ;;  %v2212_v1 = vpop.f32.mrb[15].mxu0 }
 0x22a   : > { %v3588_v2 = vadd.f32 %v2212_v1, %v1305_v29 }
 0x22c   : > { %v2496_v63 = vpop.permute.xlu1 %2495 }
 0x242   : > { %v3544_v15 = vpop.f32.mrb[16].mxu1 }
 0x243   : > { %v4688_v18 = vadd.f32 %v3574_v49, %v3544_v15  ;;  %v2385_v19 = vpop.f32.mrb[17].mxu1 }
 0x244   : > { %v4690_v39 = vadd.f32 %v3576_v7, %v2385_v19  ;;  %v3545_v16 = vpop.f32.mrb[18].mxu1 }
 0x245   : > { %v4692_v4 = vadd.f32 %v3578_v47, %v3545_v16  ;;  %v2388_v22 = vpop.f32.mrb[19].mxu1  ;;  %v2491_v47 = vpop.permute.xlu0 %2490 }
 0x246   : > { %v4694_v24 = vadd.f32 %v3580_v61, %v2388_v22  ;;  %v2536_v22 = vadd.f32 %v4690_v39, %v2491_v47  ;;  %v2597_v47 = vld [vmem:[%s274_s18 + $0x8] sm:$0xff] }
 0x248   : > { %v2552_v39 = vmul.f32 0.5, %v2536_v22 }
 0x24a   : > { %v3548_v43 = vpop.f32.mrb[20].mxu1 }
 0x24b   : > { %v3583_v21 = vadd.f32 %v3582_v62, %v3548_v43  ;;  %v2401_v31 = vpop.f32.mrb[21].mxu1 }
 0x24c   : > { %v3585_v17 = vadd.f32 %v3584_v8, %v2401_v31  ;;  %v3549_v32 = vpop.f32.mrb[22].mxu1 }
 0x24d   : > { %v3587_v26 = vadd.f32 %v3586_v0, %v3549_v32  ;;  %v2404_v56 = vpop.f32.mrb[23].mxu1  ;;  %v2542_v51 = vadd.f32 %v3583_v21, %v2521_v35 }
 0x24e   : > { %v3536_v54 = vpop.f32.mrb[0].mxu0  ;;  %v3589_v5 = vadd.f32 %v3588_v2, %v2404_v56 }
 0x24f   : > { %v3566_v50 = vadd.f32 %v3536_v54, %v3376_v10  ;;  %v2353_v27 = vpop.f32.mrb[1].mxu0  ;;  %v2540_v10 = vadd.f32 %v3585_v17, %v2511_v30  ;;  %v2543_v59 = vadd.f32 %v3587_v26, %v2526_v12  ;;  %v2537_v17 = vadd.f32 %v4694_v24, %v2496_v63 }
 0x250   : > { %v3567_v55 = vadd.f32 %v2353_v27, %v1254_v36  ;;  %v3537_v46 = vpop.f32.mrb[2].mxu0  ;;  %v2541_v23 = vadd.f32 %v3589_v5, %v2516_v34 }
 0x251   : > { %v2530_v41 = vadd.f32 %v3566_v50, %v2461_v11  ;;  %v3568_v53 = vadd.f32 %v3537_v46, %v4674_v60  ;;  %v2356_v38 = vpop.f32.mrb[3].mxu0 }
 0x252   : > { %v2528_v28 = vadd.f32 %v3567_v55, %v2451_v52  ;;  %v3569_v44 = vadd.f32 %v2356_v38, %v4676_v33 }
 0x253   : > { %v2546_v58 = vmul.f32 0.5, %v2530_v41  ;;  %v2531_v29 = vadd.f32 %v3568_v53, %v2466_v48  ;;  %v2553_v41 = vmul.f32 0.5, %v2537_v17 }
 0x254   : > { %v2544_v42 = vmul.f32 0.5, %v2528_v28  ;;  %v2529_v49 = vadd.f32 %v3569_v44, %v2456_v45  ;;  %v2598_v44 = vld [vmem:[%s274_s18 + $0x10] sm:$0xff] }
 0x255   : > { %3836 = vtanh.f32 %v2546_v58  ;;  %v2547_v7 = vmul.f32 0.5, %v2531_v29 }
 0x256   : > { %3838 = vtanh.f32 %v2544_v42  ;;  %v2545_v36 = vmul.f32 0.5, %v2529_v49  ;;  %v3540_v57 = vpop.f32.mrb[4].mxu0  ;;  %v2596_v42 = vld [vmem:[%s274_s18] sm:$0xff] }
 0x257   : > { %3840 = vtanh.f32 %v2547_v7  ;;  %v3570_v60 = vadd.f32 %v3540_v57, %v4678_v37  ;;  %v2369_v61 = vpop.f32.mrb[5].mxu0  ;;  %v2599_v7 = vld [vmem:[%s274_s18 + $0x18] sm:$0xff] }
 0x258   : > { %3842 = vtanh.f32 %v2545_v36  ;;  %v3571_v33 = vadd.f32 %v2369_v61, %v4680_v6  ;;  %v3541_v62 = vpop.f32.mrb[6].mxu0  ;;  %v2501_v6 = vpop.permute.xlu0 %2500 }
 0x259   : > { %3844 = vtanh.f32 %v2542_v51  ;;  %v2534_v8 = vadd.f32 %v3570_v60, %v2481_v9  ;;  %v3572_v13 = vadd.f32 %v3541_v62, %v4682_v20  ;;  %v2372_v0 = vpop.f32.mrb[7].mxu0  ;;  %v2506_v20 = vpop.permute.xlu1 %2505 }
 0x25a   : > { %3846 = vtanh.f32 %v2540_v10  ;;  %v2532_v1 = vadd.f32 %v3571_v33, %v2471_v3  ;;  %v3573_v2 = vadd.f32 %v2372_v0, %v4684_v40  ;;  %v2538_v3 = vadd.f32 %v4688_v18, %v2501_v6 }
 0x25b   : > { %3848 = vtanh.f32 %v2543_v59  ;;  %v2550_v52 = vmul.f32 0.5, %v2534_v8  ;;  %v2535_v37 = vadd.f32 %v3572_v13, %v2486_v25 }
 0x25c   : > { %3850 = vtanh.f32 %v2541_v23  ;;  %v2548_v11 = vmul.f32 0.5, %v2532_v1  ;;  %v2533_v45 = vadd.f32 %v3573_v2, %v4686_v14  ;;  %v2539_v14 = vadd.f32 %v4692_v4, %v2506_v20 }
 0x25d   : > { %3852 = vtanh.f32 %v2550_v52  ;;  %v2551_v48 = vmul.f32 0.5, %v2535_v37  ;;  %v2554_v26 = vmul.f32 0.5, %v2538_v3 }
 0x25e   : > { %3854 = vtanh.f32 %v2548_v11  ;;  %v2549_v15 = vmul.f32 0.5, %v2533_v45  ;;  %v2555_v4 = vmul.f32 0.5, %v2539_v14 }
 0x25f   : > { %v3837_v19 = vpop.eup %3836  ;;  %3856 = vtanh.f32 %v2551_v48 }
 0x260   : > { %v3839_v16 = vpop.eup %3838  ;;  %v2570_v40 = vmul.f32 0.5, %v3837_v19  ;;  %3858 = vtanh.f32 %v2549_v15 }
 0x261   : > { %v3841_v9 = vpop.eup %3840  ;;  %v2568_v25 = vmul.f32 0.5, %v3839_v16  ;;  %3860 = vtanh.f32 %v2554_v26 }
 0x262   : > { %v3843_v43 = vpop.eup %3842  ;;  %v2582_v30 = vadd.f32 0.5, %v2570_v40  ;;  %v2571_v21 = vmul.f32 0.5, %v3841_v9  ;;  %3862 = vtanh.f32 %v2552_v39 }
 0x263   : > { %v3845_v31 = vpop.eup %3844  ;;  %v2580_v32 = vadd.f32 0.5, %v2568_v25  ;;  %v2569_v34 = vmul.f32 0.5, %v3843_v43  ;;  %3864 = vtanh.f32 %v2555_v4 }
 0x264   : > { %v3847_v18 = vpop.eup %3846  ;;  %v2606_v56 = vmul.f32 %v3845_v31, %v2582_v30  ;;  %v2583_v54 = vadd.f32 0.5, %v2571_v21  ;;  %3866 = vtanh.f32 %v2553_v41 }
 0x265   : > { %v3849_v5 = vpop.eup %3848  ;;  %v2604_v50 = vmul.f32 %v3847_v18, %v2580_v32  ;;  %v2581_v27 = vadd.f32 0.5, %v2569_v34 }
 0x266   : > { %v3851_v55 = vpop.eup %3850  ;;  %v2607_v46 = vmul.f32 %v3849_v5, %v2583_v54 }
 0x267   : > { %v3853_v35 = vpop.eup %3852  ;;  %v2605_v53 = vmul.f32 %v3851_v55, %v2581_v27 }
 0x268   : > { %v3855_v24 = vpop.eup %3854  ;;  %v2574_v38 = vmul.f32 0.5, %v3853_v35 }
 0x269   : > { %v3857_v28 = vpop.eup %3856  ;;  %v2572_v12 = vmul.f32 0.5, %v3855_v24 }
 0x26a   : > { %v3859_v58 = vpop.eup %3858  ;;  %v2586_v29 = vadd.f32 0.5, %v2574_v38  ;;  %v2575_v49 = vmul.f32 0.5, %v3857_v28 }
 0x26b   : > { %v2584_v51 = vadd.f32 0.5, %v2572_v12  ;;  %v2573_v10 = vmul.f32 0.5, %v3859_v58  ;;  %v3861_v13 = vpop.eup %3860 }
 0x26c   : > { %v2602_v36 = vmul.f32 %v2598_v44, %v2586_v29  ;;  %v2587_v57 = vadd.f32 0.5, %v2575_v49  ;;  %v3863_v0 = vpop.eup %3862  ;;  %v2578_v52 = vmul.f32 0.5, %v3861_v13 }
 0x26d   : > { %v2600_v59 = vmul.f32 %v2596_v42, %v2584_v51  ;;  %v2585_v60 = vadd.f32 0.5, %v2573_v10  ;;  %v3865_v1 = vpop.eup %3864  ;;  %v2576_v37 = vmul.f32 0.5, %v3863_v0 }
 0x26e   : > { %v2610_v61 = vadd.f32 %v2606_v56, %v2602_v36  ;;  %v2603_v23 = vmul.f32 %v2599_v7, %v2587_v57  ;;  %v3867_v2 = vpop.eup %3866  ;;  %v2579_v11 = vmul.f32 0.5, %v3865_v1  ;;  %v2590_v6 = vadd.f32 0.5, %v2578_v52 }
 0x26f   : > { %v2608_v33 = vadd.f32 %v2604_v50, %v2600_v59  ;;  %v2601_v62 = vmul.f32 %v2597_v47, %v2585_v60  ;;  %v2577_v45 = vmul.f32 0.5, %v3867_v2  ;;  %v2588_v15 = vadd.f32 0.5, %v2576_v37 }
 0x270   : > { %3868 = vtanh.f32 %v2610_v61  ;;  %2622 = vst [vmem:[%s4712_s14 + $0x10] sm:$0xff] %v2610_v61  ;;  %v2611_v63 = vadd.f32 %v2607_v46, %v2603_v23  ;;  %v2591_v20 = vadd.f32 0.5, %v2579_v11 }
 0x271   : > { %3870 = vtanh.f32 %v2608_v33  ;;  %2620 = vst [vmem:[%s4712_s14] sm:$0xff] %v2608_v33  ;;  %v2609_v8 = vadd.f32 %v2605_v53, %v2601_v62  ;;  %v2589_v40 = vadd.f32 0.5, %v2577_v45 }
 0x272   : > { %3872 = vtanh.f32 %v2611_v63  ;;  %2623 = vst [vmem:[%s4712_s14 + $0x18] sm:$0xff] %v2611_v63 }
 0x273   : > { %3874 = vtanh.f32 %v2609_v8  ;;  %2621 = vst [vmem:[%s4712_s14 + $0x8] sm:$0xff] %v2609_v8 }
 0x27a   : > { %v3869_v48 = vpop.eup %3868  ;;  %2638 = sbr.rel (!%p4011_p6) target bundleno = 649 (0x289), region = 78 }
 0x27b   : > { %v3871_v19 = vpop.eup %3870  ;;  %v2618_v16 = vmul.f32 %v3869_v48, %v2590_v6 }
 0x27c   : > { %v3873_v3 = vpop.eup %3872  ;;  %v2616_v9 = vmul.f32 %v3871_v19, %v2588_v15 }
 0x27d   : > { %v3875_v22 = vpop.eup %3874  ;;  %2626 = vst [vmem:[%s300_s28 + $0x10] sm:$0xff] %v2618_v16  ;;  %v2619_v25 = vmul.f32 %v3873_v3, %v2591_v20 }
 0x27e   : > { %2624 = vst [vmem:[%s300_s28] sm:$0xff] %v2616_v9  ;;  %v2617_v43 = vmul.f32 %v3875_v22, %v2589_v40 }
 0x27f   : > { %2627 = vst [vmem:[%s300_s28 + $0x18] sm:$0xff] %v2619_v25 }
 0x280   : > { %2625 = vst [vmem:[%s300_s28 + $0x8] sm:$0xff] %v2617_v43 }
 0x284   : > { %v2680_v21 = vld [vmem:[%s300_s28 + $0x10] sm:$0xff] }
 0x285   : > { %v2676_v14 = vld [vmem:[%s300_s28] sm:$0xff]  ;;  %2681 = vst [vmem:[%s2642_s11 + $0x20] sm:$0xff] %v2680_v21 }
 0x286   : > { %v2682_v31 = vld [vmem:[%s300_s28 + $0x18] sm:$0xff]  ;;  %2677 = vst [vmem:[%s2642_s11] sm:$0xff] %v2676_v14 }
 0x287   : > { %v2678_v30 = vld [vmem:[%s300_s28 + $0x8] sm:$0xff]  ;;  %2683 = vst [vmem:[%s2642_s11 + $0x30] sm:$0xff] %v2682_v31 }
 0x288   : > { %2679 = vst [vmem:[%s2642_s11 + $0x10] sm:$0xff] %v2678_v30 }
 0x289 PF: > { %2689 = sbr.rel (!%p4011_p6) target bundleno = 656 (0x290), region = 116  ;;  %s3113_s12 = sshll.u32 (%p4011_p6), %s3918_s21, 3  ;;  %v2727_v17 = vld [vmem:[%s4712_s14] sm:$0xff] (%p4011_p6)  ;;  %v2729_v32 = vld [vmem:[%s4712_s14 + $0x8] sm:$0xff] (%p4011_p6)  ;;  %v2731_v34 = vld [vmem:[%s4712_s14 + $0x10] sm:$0xff] (%p4011_p6) }
 0x28a   : > { %s2691_s13 = sadd.s32 (%p4011_p6), %s3914_s20, %s3113_s12  ;;  %v2733_v18 = vld [vmem:[%s4712_s14 + $0x18] sm:$0xff] (%p4011_p6) }
 0x28b   : > { %s3114_s15 = sshll.u32 (%p4011_p6), %s2691_s13, 3 }
 0x28c   : > { %s2693_s27 = scalar_lea.vmem (%p4011_p6), %s4763_s5, %s3114_s15 }
 0x28d   : > { %2728 = vst [vmem:[%s2693_s27] sm:$0xff] (%p4011_p6), %v2727_v17  ;;  %2730 = vst [vmem:[%s2693_s27 + $0x10] sm:$0xff] (%p4011_p6), %v2729_v32 }
 0x28e   : > { %2732 = vst [vmem:[%s2693_s27 + $0x20] sm:$0xff] (%p4011_p6), %v2731_v34  ;;  %2734 = vst [vmem:[%s2693_s27 + $0x30] sm:$0xff] (%p4011_p6), %v2733_v18 }
 0x290 PF: > { %s16_s24 = sadd.s32 1, %s3930_s24   ;;  %s4769_s18 = smov %s3910_s19 }
 0x291   : > { %p13_p13 = scmp.ge.s32.totalorder %s16_s24, 6   ;;  %s4770_s19 = smov %s4019_s8 }
 0x292   : > { %s4771_s20 = smov %s3922_s22  ;;  %s4772_s21 = smov %s3926_s23 }
 0x293   : > { %s4773_s22 = smov %s4776_s25  ;;  %s4774_s23 = smov %s4780_s26 }
 0x294   :  { %15 = sbr.rel (!%p13_p13) target bundleno = 4 (0x4), region = 209 }

</bundles_post_ra>
